<compile_context>
chip_gen: v5e
topology: v5e:2x2
jax: 0.10.0
libtpu: 0.0.40
codegen_flags: <defaults>
</compile_context>

<pallas_src>
import functools
import math

import numpy as np
import jax
import jax.numpy as jnp
from jax.experimental import pallas as pl
from jax.experimental.pallas import tpu as pltpu


def _pos_embed_sine_kernel(y_ref, x_ref, o_ref):
    # y_ref: (N, rows_per_block, 1)  per-row y-half values (sin/cos already applied)
    # x_ref: (N, 1, w)               per-column x-half values
    # o_ref: (2N, rows_per_block, w) output block
    n, rb, _ = y_ref.shape
    w = x_ref.shape[-1]
    # y half: replicate each row value across the W (lane) axis.
    o_ref[0:n, :, :] = jnp.broadcast_to(y_ref[...], (n, rb, w)).astype(o_ref.dtype)
    # x half: replicate the per-column table across the row (sublane) axis.
    o_ref[n:2 * n, :, :] = jnp.broadcast_to(x_ref[...], (n, rb, w)).astype(o_ref.dtype)


def _pick_rows_per_block(h_pad, c, w, out_block_budget=4 << 20):
    """Rows per output block: a multiple of 8 dividing h_pad, as large as the
    VMEM budget allows, while keeping >=2 grid steps when h_pad permits (so the
    "parallel" grid axis can be sharded across v7x's two TensorCores)."""
    w_vmem = ((w + 127) // 128) * 128          # lane padding in VMEM
    row_bytes = c * w_vmem * 4                 # f32 VMEM bytes per output row
    q = h_pad // 8
    best = 8
    for d in range(1, q + 1):
        if q % d:
            continue
        rb = 8 * d
        if rb * row_bytes > out_block_budget:
            continue
        if h_pad // rb < 2 and h_pad > 8:
            continue                           # keep >=2 grid steps (v7x)
        best = rb
    return best


def _build_tables(h_pad, h, w, num_pos_feats, temperature, normalize, scale):
    """Host-side separable tables.

    Returns y_tab (N, h_pad, 1) and x_tab (N, 1, w) with
      tab[k, r] = sin(e(r)/dim_t[k]) for even k, cos(e(r)/dim_t[k]) for odd k,
    where e() is the (optionally normalized) 1-based row/column coordinate,
    exactly matching the PyTorch module's cumsum-of-ones + interleave."""
    n = num_pos_feats
    k = np.arange(n, dtype=np.float32)
    expo = (2.0 * np.floor(k / 2.0) / np.float32(n)).astype(np.float32)
    dim_t = np.power(np.float32(temperature), expo).astype(np.float64)   # (N,)
    inv_dim_t = 1.0 / dim_t

    y_vals = np.arange(1, h_pad + 1, dtype=np.float64)   # cumsum of ones along H
    x_vals = np.arange(1, w + 1, dtype=np.float64)       # cumsum of ones along W
    if normalize:
        eps = 1e-6
        y_vals = y_vals / (h + eps) * scale
        x_vals = x_vals / (w + eps) * scale

    arg_y = y_vals[None, :] * inv_dim_t[:, None]          # (N, h_pad)
    arg_x = x_vals[None, :] * inv_dim_t[:, None]          # (N, w)
    odd = (np.arange(n) % 2 == 1)[:, None]
    y_tab = np.where(odd, np.cos(arg_y), np.sin(arg_y)).astype(np.float32)
    x_tab = np.where(odd, np.cos(arg_x), np.sin(arg_x)).astype(np.float32)
    return y_tab[:, :, None], x_tab[:, None, :]


@functools.lru_cache(maxsize=None)
def _pos_embed_chw(h, w, num_pos_feats, temperature, normalize, scale,
                   out_dtype=jnp.float32):
    """Single (C, h, w) positional embedding, computed once and cached."""
    n = num_pos_feats
    c = 2 * n
    h_pad = ((h + 7) // 8) * 8                 # sublane-align the row axis
    rb = _pick_rows_per_block(h_pad, c, w)
    grid = h_pad // rb
    y_tab, x_tab = _build_tables(h_pad, h, w, n, temperature, normalize, scale)

    out = pl.pallas_call(
        _pos_embed_sine_kernel,
        out_shape=jax.ShapeDtypeStruct((c, h_pad, w), out_dtype),
        grid_spec=pltpu.PrefetchScalarGridSpec(
            num_scalar_prefetch=0,
            grid=(grid,),
            in_specs=[
                pl.BlockSpec((n, rb, 1), lambda i: (0, i, 0)),     # y table rows
                pl.BlockSpec((n, 1, w), lambda i: (0, 0, 0)),      # x table (resident)
            ],
            out_specs=pl.BlockSpec((c, rb, w), lambda i: (0, i, 0)),
        ),
        compiler_params=pltpu.CompilerParams(
            dimension_semantics=("parallel",),
            vmem_limit_bytes=32 * 1024 * 1024),
    )(jnp.asarray(y_tab), jnp.asarray(x_tab))

    if h_pad != h:
        out = out[:, :h, :]                    # drop row padding (rare corner case)
    return out


def position_embedding_sine(bsize, h, w, num_pos_feats=64, temperature=10000,
                            normalize=False, scale=None):
    if scale is not None and normalize is False:
        raise ValueError('normalize should be True if scale is passed')
    if scale is None:
        scale = 2 * math.pi
    # out_dtype could be jnp.bfloat16 to halve HBM writeback if the consumer
    # tolerates it (tables stay f32); default stays f32 for exact parity.
    pos = _pos_embed_chw(int(h), int(w), int(num_pos_feats), temperature,
                         bool(normalize), float(scale))
    # The embedding has no batch dependence: broadcast lazily instead of
    # recomputing / materializing bsize copies.
    return jnp.broadcast_to(pos[None], (bsize, 2 * num_pos_feats, h, w))


def _ref_position_embedding_sine(bsize, h, w, num_pos_feats=64,
                                 temperature=10000, normalize=False,
                                 scale=None):
    # Pure-JAX reference mirroring the PyTorch module exactly.
    if scale is None:
        scale = 2 * math.pi
    mask = jnp.ones((bsize, h, w), jnp.float32)
    y_embed = jnp.cumsum(mask, axis=1)
    x_embed = jnp.cumsum(mask, axis=2)
    if normalize:
        eps = 1e-6
        y_embed = y_embed / (y_embed[:, -1:, :] + eps) * scale
        x_embed = x_embed / (x_embed[:, :, -1:] + eps) * scale
    dim_t = jnp.arange(num_pos_feats, dtype=jnp.float32)
    dim_t = temperature ** (2 * (dim_t // 2) / num_pos_feats)
    pos_x = x_embed[:, :, :, None] / dim_t
    pos_y = y_embed[:, :, :, None] / dim_t
    pos_x = jnp.stack((jnp.sin(pos_x[..., 0::2]), jnp.cos(pos_x[..., 1::2])),
                      axis=4).reshape(bsize, h, w, -1)
    pos_y = jnp.stack((jnp.sin(pos_y[..., 0::2]), jnp.cos(pos_y[..., 1::2])),
                      axis=4).reshape(bsize, h, w, -1)
    pos = jnp.concatenate((pos_y, pos_x), axis=3).transpose(0, 3, 1, 2)
    return pos


if __name__ == "__main__":
    # Forward signature is (bsize, h, w); derive them from a small dummy NCHW
    # feature map, as the module would be used inside a detection model.
    key = jax.random.PRNGKey(0)
    x = jax.random.normal(key, (2, 4, 16, 16), dtype=jnp.float32)  # NCHW dummy
    bsize, _, h, w = x.shape
    num_pos_feats = 64  # module default -> 128 output channels

    pos = position_embedding_sine(bsize, h, w, num_pos_feats=num_pos_feats)
    pos = jax.block_until_ready(pos)
    ref = _ref_position_embedding_sine(bsize, h, w, num_pos_feats=num_pos_feats)
    assert pos.shape == (bsize, 2 * num_pos_feats, h, w)
    assert pos.dtype == jnp.float32
    assert jnp.allclose(pos, ref, atol=2e-5, rtol=1e-5)

    # Normalized code path of the module (scale defaults to 2*pi).
    pos_n = position_embedding_sine(bsize, h, w, num_pos_feats=num_pos_feats,
                                    normalize=True)
    pos_n = jax.block_until_ready(pos_n)
    ref_n = _ref_position_embedding_sine(bsize, h, w,
                                         num_pos_feats=num_pos_feats,
                                         normalize=True)
    assert jnp.allclose(pos_n, ref_n, atol=2e-5, rtol=1e-5)

    print("KERNEL_OK")
</pallas_src>

<mosaic_0001>
module attributes {stable_mosaic.version = 11 : i64} {
  func.func @_pos_embed_sine_kernel(%arg0: i32, %arg1: memref<64x8x1xf32, #tpu.memory_space<vmem>>, %arg2: memref<64x1x16xf32, #tpu.memory_space<vmem>>, %arg3: memref<128x8x16xf32, #tpu.memory_space<vmem>>) attributes {dimension_semantics = [#tpu.dimension_semantics<parallel>], iteration_bounds = array<i64: 2>, scalar_prefetch = 0 : i64, scratch_operands = 0 : i64, tpu.core_type = #tpu.core_type<tc>, window_params = [{transform_indices = @transform_0, window_bounds = array<i64: 64, 8, 1>}, {pipeline_mode = #tpu.pipeline_mode<synchronous>, transform_indices = @transform_1, window_bounds = array<i64: 64, 1, 16>}, {transform_indices = @transform_2, window_bounds = array<i64: 128, 8, 16>}]} {
    %c0 = arith.constant 0 : index
    %c0_0 = arith.constant 0 : index
    %c0_1 = arith.constant 0 : index
    %0 = vector.load %arg1[%c0, %c0_0, %c0_1] : memref<64x8x1xf32, #tpu.memory_space<vmem>>, vector<64x8x1xf32>
    %1 = vector.shape_cast %0 : vector<64x8x1xf32> to vector<64x8x1xf32>
    %2 = vector.broadcast %1 : vector<64x8x1xf32> to vector<64x8x16xf32>
    %c0_2 = arith.constant 0 : index
    %c0_3 = arith.constant 0 : index
    %c0_4 = arith.constant 0 : index
    %3 = vector.load %arg3[%c0_2, %c0_3, %c0_4] : memref<128x8x16xf32, #tpu.memory_space<vmem>>, vector<64x8x16xf32>
    tpu.vector_store %arg3[%c0_2, %c0_3, %c0_4], %2 {strides = array<i32>} : memref<128x8x16xf32, #tpu.memory_space<vmem>>, vector<64x8x16xf32>,
    %c0_5 = arith.constant 0 : index
    %c0_6 = arith.constant 0 : index
    %c0_7 = arith.constant 0 : index
    %4 = vector.load %arg2[%c0_5, %c0_6, %c0_7] : memref<64x1x16xf32, #tpu.memory_space<vmem>>, vector<64x1x16xf32>
    %5 = vector.shape_cast %4 : vector<64x1x16xf32> to vector<64x1x16xf32>
    %6 = vector.broadcast %5 : vector<64x1x16xf32> to vector<64x8x16xf32>
    %c64 = arith.constant 64 : index
    %c0_8 = arith.constant 0 : index
    %c0_9 = arith.constant 0 : index
    %7 = vector.load %arg3[%c64, %c0_8, %c0_9] : memref<128x8x16xf32, #tpu.memory_space<vmem>>, vector<64x8x16xf32>
    tpu.vector_store %arg3[%c64, %c0_8, %c0_9], %6 {strides = array<i32>} : memref<128x8x16xf32, #tpu.memory_space<vmem>>, vector<64x8x16xf32>,
    return
  }
  func.func @transform_0(%arg0: i32) -> (i32, i32, i32) {
    %c0_i32 = arith.constant 0 : i32
    %c0_i32_0 = arith.constant 0 : i32
    %c0_i32_1 = arith.constant 0 : i32
    return %c0_i32, %arg0, %c0_i32_0 : i32, i32, i32
  }
  func.func @transform_1(%arg0: i32) -> (i32, i32, i32) {
    %c0_i32 = arith.constant 0 : i32
    %c0_i32_0 = arith.constant 0 : i32
    %c0_i32_1 = arith.constant 0 : i32
    %c0_i32_2 = arith.constant 0 : i32
    return %c0_i32, %c0_i32_0, %c0_i32_1 : i32, i32, i32
  }
  func.func @transform_2(%arg0: i32) -> (i32, i32, i32) {
    %c0_i32 = arith.constant 0 : i32
    %c0_i32_0 = arith.constant 0 : i32
    %c0_i32_1 = arith.constant 0 : i32
    return %c0_i32, %arg0, %c0_i32_0 : i32, i32, i32
  }
}

</mosaic_0001>

<bundles_post_ra>
// kernel: tpu_custom_call.1
= control target key start
LH: loop header
LB: loop body
LE: loop exit
PB: predicated region body
PF: predicated region fallthrough
CT: control target
= control target key end

     0   :  { %s2010_s9 = smov 0   ;;  %s2012_s10 = smov 0   ;;  %s2980_s0 = inlined_call_operand.vmem [shape: f32[64,16,1], index: 0, kind: input, shape index: {}]   ;;  %s2981_s1 = inlined_call_operand.vmem [shape: f32[64,1,16], index: 1, kind: input, shape index: {}]   ;;  %s2982_s2 = inlined_call_operand.vmem [shape: f32[128,16,16], index: 2, kind: output, shape index: {}]  }
   0x1   :  { %s2014_s11 = smov 0  }
   0x2 LB: > { %s1801_s12 = sadd.s32 4294967295, %s1992_s11   ;;  %s2027_s13 = sadd.s32 1, %s1992_s11   ;;  %s1992_s11 = sphi %s2014_s11, %s2986_s11   ;;  %s1988_s10 = sphi %s2012_s10, %s2985_s10   ;;  %s1984_s9 = sphi %s2010_s9, %s2984_s9  }
   0x3   : > { %s16_s14 = ssub.s32 %s1992_s11, %s2027_s13  ;;  %s19_s15 = sadd.s32 1, %s1988_s10 }
   0x4   : > { %p17_p0 = scmp.eq.s32.totalorder %s16_s14, 0  ;;  %p26_p1 = scmp.ne.s32.totalorder %s1988_s10, %s1984_s9 }
   0x5   : > { %p27_p2 = scmp.eq.s32.totalorder %s1992_s11, 0  ;;  %p77_p3 = scmp.eq.s32.totalorder %s1801_s12, 1 }
   0x6   : > { %s2038_s16 = scalar_select %p17_p0, %s1988_s10, %s19_s15  }
   0x7   : > { %p28_p4 = por %p27_p2, %p26_p1  ;;  %p2040_p5 = por %p77_p3, %p26_p1 }
   0x8   : > { %p1804_p6 = scmp.ge.s32.totalorder %s1992_s11, 2 }
   0xa   : > { %102 = sbr.rel (%p1804_p6) target bundleno = 83 (0x53), region = 20 }
   0xf   : > { %105 = sbr.rel (!%p28_p4) target bundleno = 83 (0x53), region = 24  ;;  %s107_s18 = sand.u32 (%p28_p4), 1, %s1988_s10  }
  0x10   : > { %s1806_s19 = sshll.u32 (%p28_p4), %s1992_s11, 3  ;;  %s1805_s20 = sshll.u32 (%p28_p4), %s107_s18, 9 }
  0x11   : > { %s2050_s23 = scalar_lea.vmem (%p28_p4), %s2980_s0, %s1806_s19  ;;  %s2055_s24 = scalar_lea.vmem (%p28_p4), [#allocation2], %s1805_s20 }
  0x12   : > { %v266_v0 = vld [vmem:[%s2050_s23] sm:$0xff] (%p28_p4)  ;;  %v268_v1 = vld [vmem:[%s2050_s23 + $0x10] sm:$0xff] (%p28_p4) }
  0x13   : > { %v270_v2 = vld [vmem:[%s2050_s23 + $0x20] sm:$0xff] (%p28_p4)  ;;  %267 = vst [vmem:[%s2055_s24] sm:$0xff] (%p28_p4), %v266_v0  ;;  %v272_v3 = vld [vmem:[%s2050_s23 + $0x30] sm:$0xff] (%p28_p4) }
  0x14   : > { %269 = vst [vmem:[%s2055_s24 + $0x8] sm:$0xff] %v268_v1  ;;  %v274_v4 = vld [vmem:[%s2050_s23 + $0x40] sm:$0xff]  ;;  %v276_v5 = vld [vmem:[%s2050_s23 + $0x50] sm:$0xff] }
  0x15   : > { %271 = vst [vmem:[%s2055_s24 + $0x10] sm:$0xff] %v270_v2  ;;  %v278_v6 = vld [vmem:[%s2050_s23 + $0x60] sm:$0xff]  ;;  %v280_v7 = vld [vmem:[%s2050_s23 + $0x70] sm:$0xff] }
  0x16   : > { %273 = vst [vmem:[%s2055_s24 + $0x18] sm:$0xff] %v272_v3  ;;  %v282_v8 = vld [vmem:[%s2050_s23 + $0x80] sm:$0xff]  ;;  %v284_v9 = vld [vmem:[%s2050_s23 + $0x90] sm:$0xff] }
  0x17   : > { %275 = vst [vmem:[%s2055_s24 + $0x20] sm:$0xff] %v274_v4  ;;  %v286_v10 = vld [vmem:[%s2050_s23 + $0xa0] sm:$0xff]  ;;  %v288_v11 = vld [vmem:[%s2050_s23 + $0xb0] sm:$0xff] }
  0x18   : > { %277 = vst [vmem:[%s2055_s24 + $0x28] sm:$0xff] %v276_v5  ;;  %v290_v12 = vld [vmem:[%s2050_s23 + $0xc0] sm:$0xff]  ;;  %v292_v13 = vld [vmem:[%s2050_s23 + $0xd0] sm:$0xff] }
  0x19   : > { %279 = vst [vmem:[%s2055_s24 + $0x30] sm:$0xff] %v278_v6  ;;  %v294_v14 = vld [vmem:[%s2050_s23 + $0xe0] sm:$0xff]  ;;  %v296_v15 = vld [vmem:[%s2050_s23 + $0xf0] sm:$0xff] }
  0x1a   : > { %281 = vst [vmem:[%s2055_s24 + $0x38] sm:$0xff] %v280_v7  ;;  %v298_v16 = vld [vmem:[%s2050_s23 + $0x100] sm:$0xff]  ;;  %v300_v17 = vld [vmem:[%s2050_s23 + $0x110] sm:$0xff] }
  0x1b   : > { %283 = vst [vmem:[%s2055_s24 + $0x40] sm:$0xff] %v282_v8  ;;  %v302_v18 = vld [vmem:[%s2050_s23 + $0x120] sm:$0xff]  ;;  %v304_v19 = vld [vmem:[%s2050_s23 + $0x130] sm:$0xff] }
  0x1c   : > { %285 = vst [vmem:[%s2055_s24 + $0x48] sm:$0xff] %v284_v9  ;;  %v306_v20 = vld [vmem:[%s2050_s23 + $0x140] sm:$0xff]  ;;  %v308_v21 = vld [vmem:[%s2050_s23 + $0x150] sm:$0xff] }
  0x1d   : > { %287 = vst [vmem:[%s2055_s24 + $0x50] sm:$0xff] %v286_v10  ;;  %v310_v22 = vld [vmem:[%s2050_s23 + $0x160] sm:$0xff]  ;;  %v312_v23 = vld [vmem:[%s2050_s23 + $0x170] sm:$0xff] }
  0x1e   : > { %289 = vst [vmem:[%s2055_s24 + $0x58] sm:$0xff] %v288_v11  ;;  %v314_v24 = vld [vmem:[%s2050_s23 + $0x180] sm:$0xff]  ;;  %v316_v25 = vld [vmem:[%s2050_s23 + $0x190] sm:$0xff] }
  0x1f   : > { %291 = vst [vmem:[%s2055_s24 + $0x60] sm:$0xff] %v290_v12  ;;  %v318_v26 = vld [vmem:[%s2050_s23 + $0x1a0] sm:$0xff]  ;;  %v320_v27 = vld [vmem:[%s2050_s23 + $0x1b0] sm:$0xff] }
  0x20   : > { %293 = vst [vmem:[%s2055_s24 + $0x68] sm:$0xff] %v292_v13  ;;  %v322_v28 = vld [vmem:[%s2050_s23 + $0x1c0] sm:$0xff]  ;;  %v324_v29 = vld [vmem:[%s2050_s23 + $0x1d0] sm:$0xff] }
  0x21   : > { %295 = vst [vmem:[%s2055_s24 + $0x70] sm:$0xff] %v294_v14  ;;  %v326_v30 = vld [vmem:[%s2050_s23 + $0x1e0] sm:$0xff]  ;;  %v328_v31 = vld [vmem:[%s2050_s23 + $0x1f0] sm:$0xff] }
  0x22   : > { %297 = vst [vmem:[%s2055_s24 + $0x78] sm:$0xff] %v296_v15  ;;  %v330_v32 = vld [vmem:[%s2050_s23 + $0x200] sm:$0xff]  ;;  %v332_v33 = vld [vmem:[%s2050_s23 + $0x210] sm:$0xff] }
  0x23   : > { %299 = vst [vmem:[%s2055_s24 + $0x80] sm:$0xff] %v298_v16  ;;  %v334_v34 = vld [vmem:[%s2050_s23 + $0x220] sm:$0xff]  ;;  %v336_v35 = vld [vmem:[%s2050_s23 + $0x230] sm:$0xff] }
  0x24   : > { %301 = vst [vmem:[%s2055_s24 + $0x88] sm:$0xff] %v300_v17  ;;  %v338_v36 = vld [vmem:[%s2050_s23 + $0x240] sm:$0xff]  ;;  %v340_v37 = vld [vmem:[%s2050_s23 + $0x250] sm:$0xff] }
  0x25   : > { %303 = vst [vmem:[%s2055_s24 + $0x90] sm:$0xff] %v302_v18  ;;  %v342_v38 = vld [vmem:[%s2050_s23 + $0x260] sm:$0xff]  ;;  %v344_v39 = vld [vmem:[%s2050_s23 + $0x270] sm:$0xff] }
  0x26   : > { %305 = vst [vmem:[%s2055_s24 + $0x98] sm:$0xff] %v304_v19  ;;  %v346_v40 = vld [vmem:[%s2050_s23 + $0x280] sm:$0xff]  ;;  %v348_v41 = vld [vmem:[%s2050_s23 + $0x290] sm:$0xff] }
  0x27   : > { %307 = vst [vmem:[%s2055_s24 + $0xa0] sm:$0xff] %v306_v20  ;;  %v350_v42 = vld [vmem:[%s2050_s23 + $0x2a0] sm:$0xff]  ;;  %v352_v43 = vld [vmem:[%s2050_s23 + $0x2b0] sm:$0xff] }
  0x28   : > { %309 = vst [vmem:[%s2055_s24 + $0xa8] sm:$0xff] %v308_v21  ;;  %v354_v44 = vld [vmem:[%s2050_s23 + $0x2c0] sm:$0xff]  ;;  %v356_v45 = vld [vmem:[%s2050_s23 + $0x2d0] sm:$0xff] }
  0x29   : > { %311 = vst [vmem:[%s2055_s24 + $0xb0] sm:$0xff] %v310_v22  ;;  %v358_v46 = vld [vmem:[%s2050_s23 + $0x2e0] sm:$0xff]  ;;  %v360_v47 = vld [vmem:[%s2050_s23 + $0x2f0] sm:$0xff] }
  0x2a   : > { %313 = vst [vmem:[%s2055_s24 + $0xb8] sm:$0xff] %v312_v23  ;;  %v362_v48 = vld [vmem:[%s2050_s23 + $0x300] sm:$0xff]  ;;  %v364_v49 = vld [vmem:[%s2050_s23 + $0x310] sm:$0xff] }
  0x2b   : > { %315 = vst [vmem:[%s2055_s24 + $0xc0] sm:$0xff] %v314_v24  ;;  %v366_v50 = vld [vmem:[%s2050_s23 + $0x320] sm:$0xff]  ;;  %v368_v51 = vld [vmem:[%s2050_s23 + $0x330] sm:$0xff] }
  0x2c   : > { %317 = vst [vmem:[%s2055_s24 + $0xc8] sm:$0xff] %v316_v25  ;;  %v370_v52 = vld [vmem:[%s2050_s23 + $0x340] sm:$0xff]  ;;  %v372_v53 = vld [vmem:[%s2050_s23 + $0x350] sm:$0xff] }
  0x2d   : > { %319 = vst [vmem:[%s2055_s24 + $0xd0] sm:$0xff] %v318_v26  ;;  %v374_v54 = vld [vmem:[%s2050_s23 + $0x360] sm:$0xff]  ;;  %v376_v55 = vld [vmem:[%s2050_s23 + $0x370] sm:$0xff] }
  0x2e   : > { %321 = vst [vmem:[%s2055_s24 + $0xd8] sm:$0xff] %v320_v27  ;;  %v378_v56 = vld [vmem:[%s2050_s23 + $0x380] sm:$0xff]  ;;  %v380_v57 = vld [vmem:[%s2050_s23 + $0x390] sm:$0xff] }
  0x2f   : > { %323 = vst [vmem:[%s2055_s24 + $0xe0] sm:$0xff] %v322_v28  ;;  %v382_v58 = vld [vmem:[%s2050_s23 + $0x3a0] sm:$0xff]  ;;  %v384_v59 = vld [vmem:[%s2050_s23 + $0x3b0] sm:$0xff] }
  0x30   : > { %325 = vst [vmem:[%s2055_s24 + $0xe8] sm:$0xff] %v324_v29  ;;  %v386_v60 = vld [vmem:[%s2050_s23 + $0x3c0] sm:$0xff]  ;;  %v388_v61 = vld [vmem:[%s2050_s23 + $0x3d0] sm:$0xff] }
  0x31   : > { %327 = vst [vmem:[%s2055_s24 + $0xf0] sm:$0xff] %v326_v30  ;;  %v390_v62 = vld [vmem:[%s2050_s23 + $0x3e0] sm:$0xff]  ;;  %v392_v63 = vld [vmem:[%s2050_s23 + $0x3f0] sm:$0xff] }
  0x32   : > { %329 = vst [vmem:[%s2055_s24 + $0xf8] sm:$0xff] %v328_v31 }
  0x33   : > { %331 = vst [vmem:[%s2055_s24 + $0x100] sm:$0xff] %v330_v32 }
  0x34   : > { %333 = vst [vmem:[%s2055_s24 + $0x108] sm:$0xff] %v332_v33 }
  0x35   : > { %335 = vst [vmem:[%s2055_s24 + $0x110] sm:$0xff] %v334_v34 }
  0x36   : > { %337 = vst [vmem:[%s2055_s24 + $0x118] sm:$0xff] %v336_v35 }
  0x37   : > { %339 = vst [vmem:[%s2055_s24 + $0x120] sm:$0xff] %v338_v36 }
  0x38   : > { %341 = vst [vmem:[%s2055_s24 + $0x128] sm:$0xff] %v340_v37 }
  0x39   : > { %343 = vst [vmem:[%s2055_s24 + $0x130] sm:$0xff] %v342_v38 }
  0x3a   : > { %345 = vst [vmem:[%s2055_s24 + $0x138] sm:$0xff] %v344_v39 }
  0x3b   : > { %347 = vst [vmem:[%s2055_s24 + $0x140] sm:$0xff] %v346_v40 }
  0x3c   : > { %349 = vst [vmem:[%s2055_s24 + $0x148] sm:$0xff] %v348_v41 }
  0x3d   : > { %351 = vst [vmem:[%s2055_s24 + $0x150] sm:$0xff] %v350_v42 }
  0x3e   : > { %353 = vst [vmem:[%s2055_s24 + $0x158] sm:$0xff] %v352_v43 }
  0x3f   : > { %355 = vst [vmem:[%s2055_s24 + $0x160] sm:$0xff] %v354_v44 }
  0x40   : > { %357 = vst [vmem:[%s2055_s24 + $0x168] sm:$0xff] %v356_v45 }
  0x41   : > { %359 = vst [vmem:[%s2055_s24 + $0x170] sm:$0xff] %v358_v46 }
  0x42   : > { %361 = vst [vmem:[%s2055_s24 + $0x178] sm:$0xff] %v360_v47 }
  0x43   : > { %363 = vst [vmem:[%s2055_s24 + $0x180] sm:$0xff] %v362_v48 }
  0x44   : > { %365 = vst [vmem:[%s2055_s24 + $0x188] sm:$0xff] %v364_v49 }
  0x45   : > { %367 = vst [vmem:[%s2055_s24 + $0x190] sm:$0xff] %v366_v50 }
  0x46   : > { %369 = vst [vmem:[%s2055_s24 + $0x198] sm:$0xff] %v368_v51 }
  0x47   : > { %371 = vst [vmem:[%s2055_s24 + $0x1a0] sm:$0xff] %v370_v52 }
  0x48   : > { %373 = vst [vmem:[%s2055_s24 + $0x1a8] sm:$0xff] %v372_v53 }
  0x49   : > { %375 = vst [vmem:[%s2055_s24 + $0x1b0] sm:$0xff] %v374_v54 }
  0x4a   : > { %377 = vst [vmem:[%s2055_s24 + $0x1b8] sm:$0xff] %v376_v55 }
  0x4b   : > { %379 = vst [vmem:[%s2055_s24 + $0x1c0] sm:$0xff] %v378_v56 }
  0x4c   : > { %381 = vst [vmem:[%s2055_s24 + $0x1c8] sm:$0xff] %v380_v57 }
  0x4d   : > { %383 = vst [vmem:[%s2055_s24 + $0x1d0] sm:$0xff] %v382_v58 }
  0x4e   : > { %385 = vst [vmem:[%s2055_s24 + $0x1d8] sm:$0xff] %v384_v59 }
  0x4f   : > { %387 = vst [vmem:[%s2055_s24 + $0x1e0] sm:$0xff] %v386_v60 }
  0x50   : > { %389 = vst [vmem:[%s2055_s24 + $0x1e8] sm:$0xff] %v388_v61 }
  0x51   : > { %391 = vst [vmem:[%s2055_s24 + $0x1f0] sm:$0xff] %v390_v62 }
  0x52   : > { %393 = vst [vmem:[%s2055_s24 + $0x1f8] sm:$0xff] %v392_v63 }
  0x53 PF: > { %p1807_p7 = scmp.ge.s32.totalorder %s1992_s11, 1  ;;  %p398_p8 = scmp.lt.s32.totalorder %s1992_s11, 3 }
  0x55   : > { %p399_p9 = pnand %p1807_p7, %p398_p8 }
  0x56   : > { %s405_s25 = sand.u32 (!%p399_p9), 1, %s1984_s9  }
  0x57   : > { %402 = sbr.rel (%p399_p9) target bundleno = 472 (0x1d8), region = 62  ;;  %s1808_s26 = sshll.u32 (!%p399_p9), %s405_s25, 9 }
  0x58   : > { %s2187_s27 = scalar_lea.vmem (!%p399_p9), [#allocation2], %s1808_s26  ;;  %s1809_s28 = sshll.u32 (!%p399_p9), %s405_s25, 10 }
  0x59   : > { %s2227_s29 = scalar_lea.vmem (!%p399_p9), [#allocation3], %s1809_s28 }
  0x5c   : > { %v1994_v0 = vmov 0   ;;  %v429_v1 = vld [vmem:[%s2187_s27 + $0x20] sm:$0xff]  ;;  %v427_v2 = vld [vmem:[%s2187_s27 + $0x10] sm:$0xff]  ;;  %v430_v4 = vld [vmem:[%s2187_s27 + $0x28] sm:$0xff]  ;;  %vm809_vm0 = vcmask 130048   ;;  %s1875_s4 = sshll.u32 (%p2040_p5), %s1801_s12, 3 }
  0x5d   : > { %1905 = vset.pattern.permute.xlu2 %v1994_v0  ;;  %1904 = vset.pattern.permute.xlu1 %v1994_v0  ;;  %v425_v3 = vld [vmem:[%s2187_s27] sm:$0xff]  ;;  %v428_v5 = vld [vmem:[%s2187_s27 + $0x18] sm:$0xff]  ;;  %v426_v6 = vld [vmem:[%s2187_s27 + $0x8] sm:$0xff]  ;;  %s2714_s17 = scalar_lea.vmem (%p2040_p5), %s2982_s2, %s1875_s4 }
  0x5e   : > { %1903 = vset.pattern.permute.xlu0 %v1994_v0  ;;  %511 = vperm.xlu2 %1905, %v429_v1   ;;  %v433_v7 = vld [vmem:[%s2187_s27 + $0x40] sm:$0xff]  ;;  %v432_v8 = vld [vmem:[%s2187_s27 + $0x38] sm:$0xff]  ;;  %v431_v9 = vld [vmem:[%s2187_s27 + $0x30] sm:$0xff] }
  0x5f   : > { %501 = vperm.xlu1 %1904, %v427_v2   ;;  %491 = vperm.xlu0 %1903, %v425_v3   ;;  %v436_v10 = vld [vmem:[%s2187_s27 + $0x58] sm:$0xff]  ;;  %v435_v11 = vld [vmem:[%s2187_s27 + $0x50] sm:$0xff]  ;;  %v434_v12 = vld [vmem:[%s2187_s27 + $0x48] sm:$0xff] }
  0x60   : > { %v439_v13 = vld [vmem:[%s2187_s27 + $0x70] sm:$0xff]  ;;  %v438_v14 = vld [vmem:[%s2187_s27 + $0x68] sm:$0xff]  ;;  %v437_v15 = vld [vmem:[%s2187_s27 + $0x60] sm:$0xff] }
  0x61   : > { %v442_v16 = vld [vmem:[%s2187_s27 + $0x88] sm:$0xff]  ;;  %v441_v17 = vld [vmem:[%s2187_s27 + $0x80] sm:$0xff]  ;;  %v440_v18 = vld [vmem:[%s2187_s27 + $0x78] sm:$0xff] }
  0x62   : > { %v445_v19 = vld [vmem:[%s2187_s27 + $0xa0] sm:$0xff]  ;;  %v444_v20 = vld [vmem:[%s2187_s27 + $0x98] sm:$0xff]  ;;  %v443_v21 = vld [vmem:[%s2187_s27 + $0x90] sm:$0xff] }
  0x63   : > { %v448_v22 = vld [vmem:[%s2187_s27 + $0xb8] sm:$0xff]  ;;  %v447_v23 = vld [vmem:[%s2187_s27 + $0xb0] sm:$0xff]  ;;  %v446_v24 = vld [vmem:[%s2187_s27 + $0xa8] sm:$0xff] }
  0x64   : > { %v451_v25 = vld [vmem:[%s2187_s27 + $0xd0] sm:$0xff]  ;;  %v450_v26 = vld [vmem:[%s2187_s27 + $0xc8] sm:$0xff]  ;;  %v449_v27 = vld [vmem:[%s2187_s27 + $0xc0] sm:$0xff] }
  0x65   : > { %v454_v28 = vld [vmem:[%s2187_s27 + $0xe8] sm:$0xff]  ;;  %v453_v29 = vld [vmem:[%s2187_s27 + $0xe0] sm:$0xff]  ;;  %v452_v30 = vld [vmem:[%s2187_s27 + $0xd8] sm:$0xff] }
  0x66   : > { %516 = vperm.xlu2 %1905, %v430_v4   ;;  %v457_v31 = vld [vmem:[%s2187_s27 + $0x100] sm:$0xff]  ;;  %v456_v32 = vld [vmem:[%s2187_s27 + $0xf8] sm:$0xff]  ;;  %v455_v33 = vld [vmem:[%s2187_s27 + $0xf0] sm:$0xff] }
  0x67   : > { %506 = vperm.xlu1 %1904, %v428_v5   ;;  %496 = vperm.xlu0 %1903, %v426_v6   ;;  %v460_v34 = vld [vmem:[%s2187_s27 + $0x118] sm:$0xff]  ;;  %v459_v35 = vld [vmem:[%s2187_s27 + $0x110] sm:$0xff]  ;;  %v458_v36 = vld [vmem:[%s2187_s27 + $0x108] sm:$0xff] }
  0x68   : > { %v463_v38 = vld [vmem:[%s2187_s27 + $0x130] sm:$0xff]  ;;  %v462_v39 = vld [vmem:[%s2187_s27 + $0x128] sm:$0xff]  ;;  %v461_v40 = vld [vmem:[%s2187_s27 + $0x120] sm:$0xff] }
  0x69   : > { %v466_v42 = vld [vmem:[%s2187_s27 + $0x148] sm:$0xff]  ;;  %v465_v43 = vld [vmem:[%s2187_s27 + $0x140] sm:$0xff]  ;;  %v464_v44 = vld [vmem:[%s2187_s27 + $0x138] sm:$0xff] }
  0x6a   : > { %v469_v46 = vld [vmem:[%s2187_s27 + $0x160] sm:$0xff]  ;;  %v468_v47 = vld [vmem:[%s2187_s27 + $0x158] sm:$0xff]  ;;  %v467_v48 = vld [vmem:[%s2187_s27 + $0x150] sm:$0xff] }
  0x6b   : > { %v472_v52 = vld [vmem:[%s2187_s27 + $0x178] sm:$0xff]  ;;  %v471_v53 = vld [vmem:[%s2187_s27 + $0x170] sm:$0xff]  ;;  %v470_v54 = vld [vmem:[%s2187_s27 + $0x168] sm:$0xff] }
  0x6c   : > { %v475_v58 = vld [vmem:[%s2187_s27 + $0x190] sm:$0xff]  ;;  %v474_v59 = vld [vmem:[%s2187_s27 + $0x188] sm:$0xff]  ;;  %v473_v60 = vld [vmem:[%s2187_s27 + $0x180] sm:$0xff] }
  0x6d   : > { %v478_v0 = vld [vmem:[%s2187_s27 + $0x1a8] sm:$0xff]  ;;  %v477_v1 = vld [vmem:[%s2187_s27 + $0x1a0] sm:$0xff]  ;;  %v476_v2 = vld [vmem:[%s2187_s27 + $0x198] sm:$0xff] }
  0x6e   : > { %531 = vperm.xlu2 %1905, %v433_v7   ;;  %v481_v6 = vld [vmem:[%s2187_s27 + $0x1c0] sm:$0xff]  ;;  %v480_v7 = vld [vmem:[%s2187_s27 + $0x1b8] sm:$0xff] }
  0x6f   : > { %526 = vperm.xlu1 %1904, %v432_v8   ;;  %521 = vperm.xlu0 %1903, %v431_v9   ;;  %v479_v8 = vld [vmem:[%s2187_s27 + $0x1b0] sm:$0xff] }
  0x76   : > { %546 = vperm.xlu2 %1905, %v436_v10  }
  0x77   : > { %541 = vperm.xlu1 %1904, %v435_v11   ;;  %536 = vperm.xlu0 %1903, %v434_v12   ;;  %v484_v12 = vld [vmem:[%s2187_s27 + $0x1d8] sm:$0xff] }
  0x7e   : > { %561 = vperm.xlu2 %1905, %v439_v13   ;;  %v483_v13 = vld [vmem:[%s2187_s27 + $0x1d0] sm:$0xff] }
  0x7f   : > { %556 = vperm.xlu1 %1904, %v438_v14   ;;  %551 = vperm.xlu0 %1903, %v437_v15   ;;  %v482_v14 = vld [vmem:[%s2187_s27 + $0x1c8] sm:$0xff] }
  0x86   : > { %576 = vperm.xlu2 %1905, %v442_v16  }
  0x87   : > { %571 = vperm.xlu1 %1904, %v441_v17   ;;  %566 = vperm.xlu0 %1903, %v440_v18   ;;  %v487_v18 = vld [vmem:[%s2187_s27 + $0x1f0] sm:$0xff] }
  0x8e   : > { %591 = vperm.xlu2 %1905, %v445_v19   ;;  %v486_v19 = vld [vmem:[%s2187_s27 + $0x1e8] sm:$0xff] }
  0x8f   : > { %586 = vperm.xlu1 %1904, %v444_v20   ;;  %581 = vperm.xlu0 %1903, %v443_v21   ;;  %v485_v20 = vld [vmem:[%s2187_s27 + $0x1e0] sm:$0xff] }
  0x96   : > { %606 = vperm.xlu2 %1905, %v448_v22  }
  0x97   : > { %601 = vperm.xlu1 %1904, %v447_v23   ;;  %596 = vperm.xlu0 %1903, %v446_v24   ;;  %v488_v24 = vld [vmem:[%s2187_s27 + $0x1f8] sm:$0xff] }
  0x9e   : > { %621 = vperm.xlu2 %1905, %v451_v25  }
  0x9f   : > { %616 = vperm.xlu1 %1904, %v450_v26   ;;  %611 = vperm.xlu0 %1903, %v449_v27  }
  0xa6   : > { %636 = vperm.xlu2 %1905, %v454_v28  }
  0xa7   : > { %631 = vperm.xlu1 %1904, %v453_v29   ;;  %626 = vperm.xlu0 %1903, %v452_v30  }
  0xae   : > { %651 = vperm.xlu2 %1905, %v457_v31  }
  0xaf   : > { %646 = vperm.xlu1 %1904, %v456_v32   ;;  %641 = vperm.xlu0 %1903, %v455_v33  }
  0xb6   : > { %666 = vperm.xlu2 %1905, %v460_v34  }
  0xb7   : > { %661 = vperm.xlu1 %1904, %v459_v35   ;;  %656 = vperm.xlu0 %1903, %v458_v36  }
  0xb8   : > { %v512_v37 = vpop.permute.xlu2 %511 }
  0xb9   : > { %814 = vst.msk [vmem:[%s2227_s29 + $0x20] sm:$0xff] %vm809_vm0, %v512_v37 }
  0xbe   : > { %681 = vperm.xlu2 %1905, %v463_v38  }
  0xbf   : > { %676 = vperm.xlu1 %1904, %v462_v39   ;;  %671 = vperm.xlu0 %1903, %v461_v40  }
  0xc0   : > { %v517_v41 = vpop.permute.xlu2 %516 }
  0xc1   : > { %815 = vst.msk [vmem:[%s2227_s29 + $0x28] sm:$0xff] %vm809_vm0, %v517_v41 }
  0xc6   : > { %696 = vperm.xlu2 %1905, %v466_v42  }
  0xc7   : > { %691 = vperm.xlu1 %1904, %v465_v43   ;;  %686 = vperm.xlu0 %1903, %v464_v44  }
  0xc8   : > { %v532_v45 = vpop.permute.xlu2 %531 }
  0xc9   : > { %818 = vst.msk [vmem:[%s2227_s29 + $0x40] sm:$0xff] %vm809_vm0, %v532_v45 }
  0xce   : > { %711 = vperm.xlu2 %1905, %v469_v46  }
  0xcf   : > { %706 = vperm.xlu1 %1904, %v468_v47   ;;  %701 = vperm.xlu0 %1903, %v467_v48  }
  0xd0   : > { %v547_v49 = vpop.permute.xlu2 %546 }
  0xd1   : > { %v502_v50 = vpop.permute.xlu1 %501  ;;  %821 = vst.msk [vmem:[%s2227_s29 + $0x58] sm:$0xff] %vm809_vm0, %v547_v49  ;;  %v492_v51 = vpop.permute.xlu0 %491 }
  0xd2   : > { %812 = vst.msk [vmem:[%s2227_s29 + $0x10] sm:$0xff] %vm809_vm0, %v502_v50 }
  0xd3   : > { %810 = vst.msk [vmem:[%s2227_s29] sm:$0xff] %vm809_vm0, %v492_v51 }
  0xd6   : > { %726 = vperm.xlu2 %1905, %v472_v52  }
  0xd7   : > { %721 = vperm.xlu1 %1904, %v471_v53   ;;  %716 = vperm.xlu0 %1903, %v470_v54  }
  0xd8   : > { %v562_v55 = vpop.permute.xlu2 %561 }
  0xd9   : > { %v507_v56 = vpop.permute.xlu1 %506  ;;  %824 = vst.msk [vmem:[%s2227_s29 + $0x70] sm:$0xff] %vm809_vm0, %v562_v55  ;;  %v497_v57 = vpop.permute.xlu0 %496 }
  0xda   : > { %813 = vst.msk [vmem:[%s2227_s29 + $0x18] sm:$0xff] %vm809_vm0, %v507_v56 }
  0xdb   : > { %811 = vst.msk [vmem:[%s2227_s29 + $0x8] sm:$0xff] %vm809_vm0, %v497_v57 }
  0xde   : > { %741 = vperm.xlu2 %1905, %v475_v58  }
  0xdf   : > { %736 = vperm.xlu1 %1904, %v474_v59   ;;  %731 = vperm.xlu0 %1903, %v473_v60  }
  0xe0   : > { %v577_v61 = vpop.permute.xlu2 %576 }
  0xe1   : > { %v527_v62 = vpop.permute.xlu1 %526  ;;  %827 = vst.msk [vmem:[%s2227_s29 + $0x88] sm:$0xff] %vm809_vm0, %v577_v61  ;;  %v522_v63 = vpop.permute.xlu0 %521 }
  0xe2   : > { %817 = vst.msk [vmem:[%s2227_s29 + $0x38] sm:$0xff] %vm809_vm0, %v527_v62  ;;  %v1906_v62 = vld [vmem:[%s2981_s1] ss:$0 sm:$0xff] }
  0xe3   : > { %816 = vst.msk [vmem:[%s2227_s29 + $0x30] sm:$0xff] %vm809_vm0, %v522_v63  ;;  %v1907_v63 = vld [vmem:[%s2981_s1 + $0x1] ss:$0 sm:$0xff] }
  0xe4   : > { %1810 = vst.msk [vmem:[%s2227_s29 + $0x200] sm:$0xff] %vm809_vm0, %v1906_v62  ;;  %v1967_v62 = vld [vmem:[%s2981_s1 + $0x3d] ss:$0 sm:$0xff] }
  0xe5   : > { %1811 = vst.msk [vmem:[%s2227_s29 + $0x208] sm:$0xff] %vm809_vm0, %v1907_v63  ;;  %v1968_v63 = vld [vmem:[%s2981_s1 + $0x3e] ss:$0 sm:$0xff] }
  0xe6   : > { %756 = vperm.xlu2 %1905, %v478_v0   ;;  %1871 = vst.msk [vmem:[%s2227_s29 + $0x3e8] sm:$0xff] %vm809_vm0, %v1967_v62 }
  0xe7   : > { %751 = vperm.xlu1 %1904, %v477_v1   ;;  %746 = vperm.xlu0 %1903, %v476_v2   ;;  %v1908_v1 = vld [vmem:[%s2981_s1 + $0x2] ss:$0 sm:$0xff]  ;;  %1872 = vst.msk [vmem:[%s2227_s29 + $0x3f0] sm:$0xff] %vm809_vm0, %v1968_v63 }
  0xe8   : > { %v592_v3 = vpop.permute.xlu2 %591  ;;  %1812 = vst.msk [vmem:[%s2227_s29 + $0x210] sm:$0xff] %vm809_vm0, %v1908_v1  ;;  %v1486_v1 = vld [vmem:[%s2227_s29] sm:$0xff] (%p2040_p5) }
  0xe9   : > { %v542_v4 = vpop.permute.xlu1 %541  ;;  %830 = vst.msk [vmem:[%s2227_s29 + $0xa0] sm:$0xff] %vm809_vm0, %v592_v3  ;;  %v537_v5 = vpop.permute.xlu0 %536  ;;  %v1909_v3 = vld [vmem:[%s2981_s1 + $0x3] ss:$0 sm:$0xff] }
  0xea   : > { %820 = vst.msk [vmem:[%s2227_s29 + $0x50] sm:$0xff] %vm809_vm0, %v542_v4  ;;  %v1910_v4 = vld [vmem:[%s2981_s1 + $0x4] ss:$0 sm:$0xff] }
  0xeb   : > { %819 = vst.msk [vmem:[%s2227_s29 + $0x48] sm:$0xff] %vm809_vm0, %v537_v5  ;;  %v1911_v5 = vld [vmem:[%s2981_s1 + $0x5] ss:$0 sm:$0xff] }
  0xec   : > { %1813 = vst.msk [vmem:[%s2227_s29 + $0x218] sm:$0xff] %vm809_vm0, %v1909_v3  ;;  %v1490_v3 = vld [vmem:[%s2227_s29 + $0x10] sm:$0xff] (%p2040_p5) }
  0xed   : > { %1814 = vst.msk [vmem:[%s2227_s29 + $0x220] sm:$0xff] %vm809_vm0, %v1910_v4  ;;  %v1492_v4 = vld [vmem:[%s2227_s29 + $0x18] sm:$0xff] (%p2040_p5) }
  0xee   : > { %771 = vperm.xlu2 %1905, %v481_v6   ;;  %v1912_v6 = vld [vmem:[%s2981_s1 + $0x6] ss:$0 sm:$0xff]  ;;  %1815 = vst.msk [vmem:[%s2227_s29 + $0x228] sm:$0xff] %vm809_vm0, %v1911_v5 }
  0xef   : > { %766 = vperm.xlu1 %1904, %v480_v7   ;;  %761 = vperm.xlu0 %1903, %v479_v8   ;;  %v1913_v7 = vld [vmem:[%s2981_s1 + $0x7] ss:$0 sm:$0xff]  ;;  %v1914_v8 = vld [vmem:[%s2981_s1 + $0x8] ss:$0 sm:$0xff]  ;;  %1816 = vst.msk [vmem:[%s2227_s29 + $0x230] sm:$0xff] %vm809_vm0, %v1912_v6 }
  0xf0   : > { %v607_v9 = vpop.permute.xlu2 %606  ;;  %1817 = vst.msk [vmem:[%s2227_s29 + $0x238] sm:$0xff] %vm809_vm0, %v1913_v7  ;;  %v1494_v5 = vld [vmem:[%s2227_s29 + $0x20] sm:$0xff] (%p2040_p5)  ;;  %v1496_v6 = vld [vmem:[%s2227_s29 + $0x28] sm:$0xff] (%p2040_p5)  ;;  %v1498_v7 = vld [vmem:[%s2227_s29 + $0x30] sm:$0xff] (%p2040_p5) }
  0xf1   : > { %v557_v10 = vpop.permute.xlu1 %556  ;;  %833 = vst.msk [vmem:[%s2227_s29 + $0xb8] sm:$0xff] %vm809_vm0, %v607_v9  ;;  %v552_v11 = vpop.permute.xlu0 %551  ;;  %v1915_v9 = vld [vmem:[%s2981_s1 + $0x9] ss:$0 sm:$0xff] }
  0xf2   : > { %823 = vst.msk [vmem:[%s2227_s29 + $0x68] sm:$0xff] %vm809_vm0, %v557_v10 }
  0xf3   : > { %822 = vst.msk [vmem:[%s2227_s29 + $0x60] sm:$0xff] %vm809_vm0, %v552_v11  ;;  %v1916_v11 = vld [vmem:[%s2981_s1 + $0xa] ss:$0 sm:$0xff] }
  0xf4   : > { %1818 = vst.msk [vmem:[%s2227_s29 + $0x240] sm:$0xff] %vm809_vm0, %v1914_v8  ;;  %v1500_v8 = vld [vmem:[%s2227_s29 + $0x38] sm:$0xff] (%p2040_p5) }
  0xf5   : > { %1819 = vst.msk [vmem:[%s2227_s29 + $0x248] sm:$0xff] %vm809_vm0, %v1915_v9  ;;  %v1502_v9 = vld [vmem:[%s2227_s29 + $0x40] sm:$0xff] (%p2040_p5) }
  0xf6   : > { %786 = vperm.xlu2 %1905, %v484_v12   ;;  %v1917_v12 = vld [vmem:[%s2981_s1 + $0xb] ss:$0 sm:$0xff]  ;;  %1820 = vst.msk [vmem:[%s2227_s29 + $0x250] sm:$0xff] %vm809_vm0, %v1916_v11  ;;  %v1506_v11 = vld [vmem:[%s2227_s29 + $0x50] sm:$0xff] (%p2040_p5) }
  0xf7   : > { %781 = vperm.xlu1 %1904, %v483_v13   ;;  %776 = vperm.xlu0 %1903, %v482_v14   ;;  %v1918_v13 = vld [vmem:[%s2981_s1 + $0xc] ss:$0 sm:$0xff]  ;;  %v1919_v14 = vld [vmem:[%s2981_s1 + $0xd] ss:$0 sm:$0xff]  ;;  %1821 = vst.msk [vmem:[%s2227_s29 + $0x258] sm:$0xff] %vm809_vm0, %v1917_v12  ;;  %v1508_v12 = vld [vmem:[%s2227_s29 + $0x58] sm:$0xff] (%p2040_p5) }
  0xf8   : > { %v622_v15 = vpop.permute.xlu2 %621  ;;  %1822 = vst.msk [vmem:[%s2227_s29 + $0x260] sm:$0xff] %vm809_vm0, %v1918_v13 }
  0xf9   : > { %v572_v16 = vpop.permute.xlu1 %571  ;;  %836 = vst.msk [vmem:[%s2227_s29 + $0xd0] sm:$0xff] %vm809_vm0, %v622_v15  ;;  %v567_v17 = vpop.permute.xlu0 %566  ;;  %v1920_v15 = vld [vmem:[%s2981_s1 + $0xe] ss:$0 sm:$0xff] }
  0xfa   : > { %826 = vst.msk [vmem:[%s2227_s29 + $0x80] sm:$0xff] %vm809_vm0, %v572_v16  ;;  %v1921_v16 = vld [vmem:[%s2981_s1 + $0xf] ss:$0 sm:$0xff]  ;;  %v1510_v13 = vld [vmem:[%s2227_s29 + $0x60] sm:$0xff] (%p2040_p5) }
  0xfb   : > { %825 = vst.msk [vmem:[%s2227_s29 + $0x78] sm:$0xff] %vm809_vm0, %v567_v17  ;;  %v1922_v17 = vld [vmem:[%s2981_s1 + $0x10] ss:$0 sm:$0xff] }
  0xfc   : > { %1823 = vst.msk [vmem:[%s2227_s29 + $0x268] sm:$0xff] %vm809_vm0, %v1919_v14  ;;  %v1512_v14 = vld [vmem:[%s2227_s29 + $0x68] sm:$0xff] (%p2040_p5) }
  0xfd   : > { %1824 = vst.msk [vmem:[%s2227_s29 + $0x270] sm:$0xff] %vm809_vm0, %v1920_v15  ;;  %v1514_v15 = vld [vmem:[%s2227_s29 + $0x70] sm:$0xff] (%p2040_p5) }
  0xfe   : > { %801 = vperm.xlu2 %1905, %v487_v18   ;;  %v1923_v18 = vld [vmem:[%s2981_s1 + $0x11] ss:$0 sm:$0xff]  ;;  %1825 = vst.msk [vmem:[%s2227_s29 + $0x278] sm:$0xff] %vm809_vm0, %v1921_v16 }
  0xff   : > { %796 = vperm.xlu1 %1904, %v486_v19   ;;  %791 = vperm.xlu0 %1903, %v485_v20   ;;  %v1924_v19 = vld [vmem:[%s2981_s1 + $0x12] ss:$0 sm:$0xff]  ;;  %v1925_v20 = vld [vmem:[%s2981_s1 + $0x13] ss:$0 sm:$0xff]  ;;  %1826 = vst.msk [vmem:[%s2227_s29 + $0x280] sm:$0xff] %vm809_vm0, %v1922_v17 }
 0x100   : > { %v637_v21 = vpop.permute.xlu2 %636  ;;  %1827 = vst.msk [vmem:[%s2227_s29 + $0x288] sm:$0xff] %vm809_vm0, %v1923_v18  ;;  %v1520_v18 = vld [vmem:[%s2227_s29 + $0x88] sm:$0xff] (%p2040_p5) }
 0x101   : > { %v587_v22 = vpop.permute.xlu1 %586  ;;  %839 = vst.msk [vmem:[%s2227_s29 + $0xe8] sm:$0xff] %vm809_vm0, %v637_v21  ;;  %v582_v23 = vpop.permute.xlu0 %581  ;;  %v1926_v21 = vld [vmem:[%s2981_s1 + $0x14] ss:$0 sm:$0xff]  ;;  %v1518_v17 = vld [vmem:[%s2227_s29 + $0x80] sm:$0xff] (%p2040_p5) }
 0x102   : > { %829 = vst.msk [vmem:[%s2227_s29 + $0x98] sm:$0xff] %vm809_vm0, %v587_v22  ;;  %v1927_v22 = vld [vmem:[%s2981_s1 + $0x15] ss:$0 sm:$0xff]  ;;  %v1516_v16 = vld [vmem:[%s2227_s29 + $0x78] sm:$0xff] (%p2040_p5) }
 0x103   : > { %828 = vst.msk [vmem:[%s2227_s29 + $0x90] sm:$0xff] %vm809_vm0, %v582_v23  ;;  %v1928_v23 = vld [vmem:[%s2981_s1 + $0x16] ss:$0 sm:$0xff] }
 0x104   : > { %1828 = vst.msk [vmem:[%s2227_s29 + $0x290] sm:$0xff] %vm809_vm0, %v1924_v19 }
 0x105   : > { %1829 = vst.msk [vmem:[%s2227_s29 + $0x298] sm:$0xff] %vm809_vm0, %v1925_v20 }
 0x106   : > { %1830 = vst.msk [vmem:[%s2227_s29 + $0x2a0] sm:$0xff] %vm809_vm0, %v1926_v21  ;;  %v1526_v21 = vld [vmem:[%s2227_s29 + $0xa0] sm:$0xff] (%p2040_p5) }
 0x107   : > { %806 = vperm.xlu0 %1903, %v488_v24   ;;  %v1929_v24 = vld [vmem:[%s2981_s1 + $0x17] ss:$0 sm:$0xff]  ;;  %1831 = vst.msk [vmem:[%s2227_s29 + $0x2a8] sm:$0xff] %vm809_vm0, %v1927_v22 }
 0x108   : > { %v652_v25 = vpop.permute.xlu2 %651  ;;  %1832 = vst.msk [vmem:[%s2227_s29 + $0x2b0] sm:$0xff] %vm809_vm0, %v1928_v23 }
 0x109   : > { %v602_v26 = vpop.permute.xlu1 %601  ;;  %842 = vst.msk [vmem:[%s2227_s29 + $0x100] sm:$0xff] %vm809_vm0, %v652_v25  ;;  %v597_v27 = vpop.permute.xlu0 %596  ;;  %v1930_v25 = vld [vmem:[%s2981_s1 + $0x18] ss:$0 sm:$0xff] }
 0x10a   : > { %832 = vst.msk [vmem:[%s2227_s29 + $0xb0] sm:$0xff] %vm809_vm0, %v602_v26  ;;  %v1931_v26 = vld [vmem:[%s2981_s1 + $0x19] ss:$0 sm:$0xff]  ;;  %v1522_v19 = vld [vmem:[%s2227_s29 + $0x90] sm:$0xff] (%p2040_p5) }
 0x10b   : > { %831 = vst.msk [vmem:[%s2227_s29 + $0xa8] sm:$0xff] %vm809_vm0, %v597_v27  ;;  %v1932_v27 = vld [vmem:[%s2981_s1 + $0x1a] ss:$0 sm:$0xff] }
 0x10c   : > { %1833 = vst.msk [vmem:[%s2227_s29 + $0x2b8] sm:$0xff] %vm809_vm0, %v1929_v24  ;;  %v1524_v20 = vld [vmem:[%s2227_s29 + $0x98] sm:$0xff] (%p2040_p5) }
 0x10d   : > { %1834 = vst.msk [vmem:[%s2227_s29 + $0x2c0] sm:$0xff] %vm809_vm0, %v1930_v25  ;;  %v1532_v24 = vld [vmem:[%s2227_s29 + $0xb8] sm:$0xff] (%p2040_p5) }
 0x10e   : > { %1835 = vst.msk [vmem:[%s2227_s29 + $0x2c8] sm:$0xff] %vm809_vm0, %v1931_v26 }
 0x10f   : > { %1836 = vst.msk [vmem:[%s2227_s29 + $0x2d0] sm:$0xff] %vm809_vm0, %v1932_v27  ;;  %v1538_v27 = vld [vmem:[%s2227_s29 + $0xd0] sm:$0xff] (%p2040_p5) }
 0x110   : > { %v667_v28 = vpop.permute.xlu2 %666  ;;  %1487 = vst [vmem:[%s2714_s17] sm:$0xff] (%p2040_p5), %v1486_v1  ;;  %v1614_v1 = vld [vmem:[%s2227_s29 + $0x200] sm:$0xff] (%p2040_p5) }
 0x111   : > { %v617_v29 = vpop.permute.xlu1 %616  ;;  %845 = vst.msk [vmem:[%s2227_s29 + $0x118] sm:$0xff] %vm809_vm0, %v667_v28  ;;  %v612_v30 = vpop.permute.xlu0 %611  ;;  %v1933_v28 = vld [vmem:[%s2981_s1 + $0x1b] ss:$0 sm:$0xff]  ;;  %v1530_v23 = vld [vmem:[%s2227_s29 + $0xb0] sm:$0xff] (%p2040_p5) }
 0x112   : > { %835 = vst.msk [vmem:[%s2227_s29 + $0xc8] sm:$0xff] %vm809_vm0, %v617_v29  ;;  %v1934_v29 = vld [vmem:[%s2981_s1 + $0x1c] ss:$0 sm:$0xff]  ;;  %v1528_v22 = vld [vmem:[%s2227_s29 + $0xa8] sm:$0xff] (%p2040_p5) }
 0x113   : > { %834 = vst.msk [vmem:[%s2227_s29 + $0xc0] sm:$0xff] %vm809_vm0, %v612_v30  ;;  %v1935_v30 = vld [vmem:[%s2981_s1 + $0x1d] ss:$0 sm:$0xff] }
 0x114   : > { %1837 = vst.msk [vmem:[%s2227_s29 + $0x2d8] sm:$0xff] %vm809_vm0, %v1933_v28 }
 0x115   : > { %1838 = vst.msk [vmem:[%s2227_s29 + $0x2e0] sm:$0xff] %vm809_vm0, %v1934_v29 }
 0x116   : > { %1839 = vst.msk [vmem:[%s2227_s29 + $0x2e8] sm:$0xff] %vm809_vm0, %v1935_v30  ;;  %v1544_v30 = vld [vmem:[%s2227_s29 + $0xe8] sm:$0xff] (%p2040_p5) }
 0x117   : > { %1491 = vst [vmem:[%s2714_s17 + $0x20] sm:$0xff] (%p2040_p5), %v1490_v3  ;;  %v1618_v3 = vld [vmem:[%s2227_s29 + $0x210] sm:$0xff] (%p2040_p5) }
 0x118   : > { %v682_v31 = vpop.permute.xlu2 %681  ;;  %1493 = vst [vmem:[%s2714_s17 + $0x30] sm:$0xff] (%p2040_p5), %v1492_v4  ;;  %v1620_v4 = vld [vmem:[%s2227_s29 + $0x218] sm:$0xff] (%p2040_p5) }
 0x119   : > { %v632_v32 = vpop.permute.xlu1 %631  ;;  %848 = vst.msk [vmem:[%s2227_s29 + $0x130] sm:$0xff] %vm809_vm0, %v682_v31  ;;  %v627_v33 = vpop.permute.xlu0 %626  ;;  %v1936_v31 = vld [vmem:[%s2981_s1 + $0x1e] ss:$0 sm:$0xff]  ;;  %v1536_v26 = vld [vmem:[%s2227_s29 + $0xc8] sm:$0xff] (%p2040_p5) }
 0x11a   : > { %838 = vst.msk [vmem:[%s2227_s29 + $0xe0] sm:$0xff] %vm809_vm0, %v632_v32  ;;  %v1937_v32 = vld [vmem:[%s2981_s1 + $0x1f] ss:$0 sm:$0xff]  ;;  %v1534_v25 = vld [vmem:[%s2227_s29 + $0xc0] sm:$0xff] (%p2040_p5) }
 0x11b   : > { %837 = vst.msk [vmem:[%s2227_s29 + $0xd8] sm:$0xff] %vm809_vm0, %v627_v33  ;;  %v1938_v33 = vld [vmem:[%s2981_s1 + $0x20] ss:$0 sm:$0xff] }
 0x11c   : > { %1840 = vst.msk [vmem:[%s2227_s29 + $0x2f0] sm:$0xff] %vm809_vm0, %v1936_v31 }
 0x11d   : > { %1841 = vst.msk [vmem:[%s2227_s29 + $0x2f8] sm:$0xff] %vm809_vm0, %v1937_v32 }
 0x11e   : > { %1842 = vst.msk [vmem:[%s2227_s29 + $0x300] sm:$0xff] %vm809_vm0, %v1938_v33  ;;  %v1550_v33 = vld [vmem:[%s2227_s29 + $0x100] sm:$0xff] (%p2040_p5) }
 0x11f   : > { %1495 = vst [vmem:[%s2714_s17 + $0x40] sm:$0xff] (%p2040_p5), %v1494_v5  ;;  %v1622_v5 = vld [vmem:[%s2227_s29 + $0x220] sm:$0xff] (%p2040_p5) }
 0x120   : > { %v697_v34 = vpop.permute.xlu2 %696  ;;  %1497 = vst [vmem:[%s2714_s17 + $0x50] sm:$0xff] (%p2040_p5), %v1496_v6  ;;  %v1624_v6 = vld [vmem:[%s2227_s29 + $0x228] sm:$0xff] (%p2040_p5) }
 0x121   : > { %v647_v35 = vpop.permute.xlu1 %646  ;;  %851 = vst.msk [vmem:[%s2227_s29 + $0x148] sm:$0xff] %vm809_vm0, %v697_v34  ;;  %v642_v36 = vpop.permute.xlu0 %641  ;;  %v1939_v34 = vld [vmem:[%s2981_s1 + $0x21] ss:$0 sm:$0xff] }
 0x122   : > { %841 = vst.msk [vmem:[%s2227_s29 + $0xf8] sm:$0xff] %vm809_vm0, %v647_v35  ;;  %v1940_v35 = vld [vmem:[%s2981_s1 + $0x22] ss:$0 sm:$0xff]  ;;  %v1540_v28 = vld [vmem:[%s2227_s29 + $0xd8] sm:$0xff] (%p2040_p5) }
 0x123   : > { %840 = vst.msk [vmem:[%s2227_s29 + $0xf0] sm:$0xff] %vm809_vm0, %v642_v36  ;;  %v1941_v36 = vld [vmem:[%s2981_s1 + $0x23] ss:$0 sm:$0xff] }
 0x124   : > { %1843 = vst.msk [vmem:[%s2227_s29 + $0x308] sm:$0xff] %vm809_vm0, %v1939_v34  ;;  %v1542_v29 = vld [vmem:[%s2227_s29 + $0xe0] sm:$0xff] (%p2040_p5) }
 0x125   : > { %1844 = vst.msk [vmem:[%s2227_s29 + $0x310] sm:$0xff] %vm809_vm0, %v1940_v35 }
 0x126   : > { %1845 = vst.msk [vmem:[%s2227_s29 + $0x318] sm:$0xff] %vm809_vm0, %v1941_v36  ;;  %v1556_v36 = vld [vmem:[%s2227_s29 + $0x118] sm:$0xff] (%p2040_p5) }
 0x127   : > { %1499 = vst [vmem:[%s2714_s17 + $0x60] sm:$0xff] (%p2040_p5), %v1498_v7  ;;  %v1626_v7 = vld [vmem:[%s2227_s29 + $0x230] sm:$0xff] (%p2040_p5) }
 0x128   : > { %v712_v37 = vpop.permute.xlu2 %711  ;;  %1501 = vst [vmem:[%s2714_s17 + $0x70] sm:$0xff] (%p2040_p5), %v1500_v8  ;;  %v1628_v8 = vld [vmem:[%s2227_s29 + $0x238] sm:$0xff] (%p2040_p5) }
 0x129   : > { %v662_v38 = vpop.permute.xlu1 %661  ;;  %854 = vst.msk [vmem:[%s2227_s29 + $0x160] sm:$0xff] %vm809_vm0, %v712_v37  ;;  %v657_v39 = vpop.permute.xlu0 %656  ;;  %v1942_v37 = vld [vmem:[%s2981_s1 + $0x24] ss:$0 sm:$0xff]  ;;  %v1548_v32 = vld [vmem:[%s2227_s29 + $0xf8] sm:$0xff] (%p2040_p5) }
 0x12a   : > { %844 = vst.msk [vmem:[%s2227_s29 + $0x110] sm:$0xff] %vm809_vm0, %v662_v38  ;;  %v1943_v38 = vld [vmem:[%s2981_s1 + $0x25] ss:$0 sm:$0xff]  ;;  %v1546_v31 = vld [vmem:[%s2227_s29 + $0xf0] sm:$0xff] (%p2040_p5) }
 0x12b   : > { %843 = vst.msk [vmem:[%s2227_s29 + $0x108] sm:$0xff] %vm809_vm0, %v657_v39  ;;  %v1944_v39 = vld [vmem:[%s2981_s1 + $0x26] ss:$0 sm:$0xff] }
 0x12c   : > { %1846 = vst.msk [vmem:[%s2227_s29 + $0x320] sm:$0xff] %vm809_vm0, %v1942_v37 }
 0x12d   : > { %1847 = vst.msk [vmem:[%s2227_s29 + $0x328] sm:$0xff] %vm809_vm0, %v1943_v38 }
 0x12e   : > { %1848 = vst.msk [vmem:[%s2227_s29 + $0x330] sm:$0xff] %vm809_vm0, %v1944_v39  ;;  %v1562_v39 = vld [vmem:[%s2227_s29 + $0x130] sm:$0xff] (%p2040_p5) }
 0x12f   : > { %1503 = vst [vmem:[%s2714_s17 + $0x80] sm:$0xff] (%p2040_p5), %v1502_v9  ;;  %v1630_v9 = vld [vmem:[%s2227_s29 + $0x240] sm:$0xff] (%p2040_p5) }
 0x130   : > { %v727_v40 = vpop.permute.xlu2 %726  ;;  %1507 = vst [vmem:[%s2714_s17 + $0xa0] sm:$0xff] (%p2040_p5), %v1506_v11  ;;  %v1634_v11 = vld [vmem:[%s2227_s29 + $0x250] sm:$0xff] (%p2040_p5) }
 0x131   : > { %v677_v41 = vpop.permute.xlu1 %676  ;;  %857 = vst.msk [vmem:[%s2227_s29 + $0x178] sm:$0xff] %vm809_vm0, %v727_v40  ;;  %v672_v42 = vpop.permute.xlu0 %671  ;;  %v1945_v40 = vld [vmem:[%s2981_s1 + $0x27] ss:$0 sm:$0xff]  ;;  %v1554_v35 = vld [vmem:[%s2227_s29 + $0x110] sm:$0xff] (%p2040_p5) }
 0x132   : > { %847 = vst.msk [vmem:[%s2227_s29 + $0x128] sm:$0xff] %vm809_vm0, %v677_v41  ;;  %v1946_v41 = vld [vmem:[%s2981_s1 + $0x28] ss:$0 sm:$0xff] }
 0x133   : > { %846 = vst.msk [vmem:[%s2227_s29 + $0x120] sm:$0xff] %vm809_vm0, %v672_v42  ;;  %v1947_v42 = vld [vmem:[%s2981_s1 + $0x29] ss:$0 sm:$0xff] }
 0x134   : > { %1849 = vst.msk [vmem:[%s2227_s29 + $0x338] sm:$0xff] %vm809_vm0, %v1945_v40  ;;  %v1552_v34 = vld [vmem:[%s2227_s29 + $0x108] sm:$0xff] (%p2040_p5) }
 0x135   : > { %1850 = vst.msk [vmem:[%s2227_s29 + $0x340] sm:$0xff] %vm809_vm0, %v1946_v41 }
 0x136   : > { %1851 = vst.msk [vmem:[%s2227_s29 + $0x348] sm:$0xff] %vm809_vm0, %v1947_v42  ;;  %v1568_v42 = vld [vmem:[%s2227_s29 + $0x148] sm:$0xff] (%p2040_p5) }
 0x137   : > { %1509 = vst [vmem:[%s2714_s17 + $0xb0] sm:$0xff] (%p2040_p5), %v1508_v12  ;;  %v1636_v12 = vld [vmem:[%s2227_s29 + $0x258] sm:$0xff] (%p2040_p5) }
 0x138   : > { %v742_v43 = vpop.permute.xlu2 %741  ;;  %1511 = vst [vmem:[%s2714_s17 + $0xc0] sm:$0xff] (%p2040_p5), %v1510_v13  ;;  %v1638_v13 = vld [vmem:[%s2227_s29 + $0x260] sm:$0xff] (%p2040_p5) }
 0x139   : > { %v692_v44 = vpop.permute.xlu1 %691  ;;  %860 = vst.msk [vmem:[%s2227_s29 + $0x190] sm:$0xff] %vm809_vm0, %v742_v43  ;;  %v687_v45 = vpop.permute.xlu0 %686  ;;  %v1948_v43 = vld [vmem:[%s2981_s1 + $0x2a] ss:$0 sm:$0xff] }
 0x13a   : > { %850 = vst.msk [vmem:[%s2227_s29 + $0x140] sm:$0xff] %vm809_vm0, %v692_v44  ;;  %v1949_v44 = vld [vmem:[%s2981_s1 + $0x2b] ss:$0 sm:$0xff]  ;;  %v1558_v37 = vld [vmem:[%s2227_s29 + $0x120] sm:$0xff] (%p2040_p5) }
 0x13b   : > { %849 = vst.msk [vmem:[%s2227_s29 + $0x138] sm:$0xff] %vm809_vm0, %v687_v45  ;;  %v1950_v45 = vld [vmem:[%s2981_s1 + $0x2c] ss:$0 sm:$0xff] }
 0x13c   : > { %1852 = vst.msk [vmem:[%s2227_s29 + $0x350] sm:$0xff] %vm809_vm0, %v1948_v43  ;;  %v1560_v38 = vld [vmem:[%s2227_s29 + $0x128] sm:$0xff] (%p2040_p5) }
 0x13d   : > { %1853 = vst.msk [vmem:[%s2227_s29 + $0x358] sm:$0xff] %vm809_vm0, %v1949_v44 }
 0x13e   : > { %1854 = vst.msk [vmem:[%s2227_s29 + $0x360] sm:$0xff] %vm809_vm0, %v1950_v45  ;;  %v1574_v45 = vld [vmem:[%s2227_s29 + $0x160] sm:$0xff] (%p2040_p5) }
 0x13f   : > { %1513 = vst [vmem:[%s2714_s17 + $0xd0] sm:$0xff] (%p2040_p5), %v1512_v14  ;;  %v1640_v14 = vld [vmem:[%s2227_s29 + $0x268] sm:$0xff] (%p2040_p5) }
 0x140   : > { %v757_v46 = vpop.permute.xlu2 %756  ;;  %1515 = vst [vmem:[%s2714_s17 + $0xe0] sm:$0xff] (%p2040_p5), %v1514_v15  ;;  %v1642_v15 = vld [vmem:[%s2227_s29 + $0x270] sm:$0xff] (%p2040_p5) }
 0x141   : > { %v707_v47 = vpop.permute.xlu1 %706  ;;  %863 = vst.msk [vmem:[%s2227_s29 + $0x1a8] sm:$0xff] %vm809_vm0, %v757_v46  ;;  %v702_v48 = vpop.permute.xlu0 %701  ;;  %v1951_v46 = vld [vmem:[%s2981_s1 + $0x2d] ss:$0 sm:$0xff]  ;;  %v1566_v41 = vld [vmem:[%s2227_s29 + $0x140] sm:$0xff] (%p2040_p5) }
 0x142   : > { %853 = vst.msk [vmem:[%s2227_s29 + $0x158] sm:$0xff] %vm809_vm0, %v707_v47  ;;  %v1952_v47 = vld [vmem:[%s2981_s1 + $0x2e] ss:$0 sm:$0xff]  ;;  %v1564_v40 = vld [vmem:[%s2227_s29 + $0x138] sm:$0xff] (%p2040_p5) }
 0x143   : > { %852 = vst.msk [vmem:[%s2227_s29 + $0x150] sm:$0xff] %vm809_vm0, %v702_v48  ;;  %v1953_v48 = vld [vmem:[%s2981_s1 + $0x2f] ss:$0 sm:$0xff] }
 0x144   : > { %1855 = vst.msk [vmem:[%s2227_s29 + $0x368] sm:$0xff] %vm809_vm0, %v1951_v46 }
 0x145   : > { %1856 = vst.msk [vmem:[%s2227_s29 + $0x370] sm:$0xff] %vm809_vm0, %v1952_v47 }
 0x146   : > { %1857 = vst.msk [vmem:[%s2227_s29 + $0x378] sm:$0xff] %vm809_vm0, %v1953_v48  ;;  %v1580_v48 = vld [vmem:[%s2227_s29 + $0x178] sm:$0xff] (%p2040_p5) }
 0x147   : > { %1517 = vst [vmem:[%s2714_s17 + $0xf0] sm:$0xff] (%p2040_p5), %v1516_v16  ;;  %v1644_v16 = vld [vmem:[%s2227_s29 + $0x278] sm:$0xff] (%p2040_p5) }
 0x148   : > { %v772_v49 = vpop.permute.xlu2 %771  ;;  %1519 = vst [vmem:[%s2714_s17 + $0x100] sm:$0xff] (%p2040_p5), %v1518_v17  ;;  %v1646_v17 = vld [vmem:[%s2227_s29 + $0x280] sm:$0xff] (%p2040_p5) }
 0x149   : > { %v722_v50 = vpop.permute.xlu1 %721  ;;  %866 = vst.msk [vmem:[%s2227_s29 + $0x1c0] sm:$0xff] %vm809_vm0, %v772_v49  ;;  %v717_v51 = vpop.permute.xlu0 %716  ;;  %v1954_v49 = vld [vmem:[%s2981_s1 + $0x30] ss:$0 sm:$0xff]  ;;  %v1572_v44 = vld [vmem:[%s2227_s29 + $0x158] sm:$0xff] (%p2040_p5) }
 0x14a   : > { %856 = vst.msk [vmem:[%s2227_s29 + $0x170] sm:$0xff] %vm809_vm0, %v722_v50  ;;  %v1955_v50 = vld [vmem:[%s2981_s1 + $0x31] ss:$0 sm:$0xff] }
 0x14b   : > { %855 = vst.msk [vmem:[%s2227_s29 + $0x168] sm:$0xff] %vm809_vm0, %v717_v51  ;;  %v1956_v51 = vld [vmem:[%s2981_s1 + $0x32] ss:$0 sm:$0xff] }
 0x14c   : > { %1858 = vst.msk [vmem:[%s2227_s29 + $0x380] sm:$0xff] %vm809_vm0, %v1954_v49  ;;  %v1570_v43 = vld [vmem:[%s2227_s29 + $0x150] sm:$0xff] (%p2040_p5) }
 0x14d   : > { %1859 = vst.msk [vmem:[%s2227_s29 + $0x388] sm:$0xff] %vm809_vm0, %v1955_v50 }
 0x14e   : > { %1860 = vst.msk [vmem:[%s2227_s29 + $0x390] sm:$0xff] %vm809_vm0, %v1956_v51  ;;  %v1586_v51 = vld [vmem:[%s2227_s29 + $0x190] sm:$0xff] (%p2040_p5) }
 0x14f   : > { %1521 = vst [vmem:[%s2714_s17 + $0x110] sm:$0xff] (%p2040_p5), %v1520_v18  ;;  %v1648_v18 = vld [vmem:[%s2227_s29 + $0x288] sm:$0xff] (%p2040_p5) }
 0x150   : > { %v787_v52 = vpop.permute.xlu2 %786  ;;  %1523 = vst [vmem:[%s2714_s17 + $0x120] sm:$0xff] (%p2040_p5), %v1522_v19  ;;  %v1650_v19 = vld [vmem:[%s2227_s29 + $0x290] sm:$0xff] (%p2040_p5) }
 0x151   : > { %v737_v53 = vpop.permute.xlu1 %736  ;;  %869 = vst.msk [vmem:[%s2227_s29 + $0x1d8] sm:$0xff] %vm809_vm0, %v787_v52  ;;  %v732_v54 = vpop.permute.xlu0 %731  ;;  %v1957_v52 = vld [vmem:[%s2981_s1 + $0x33] ss:$0 sm:$0xff] }
 0x152   : > { %859 = vst.msk [vmem:[%s2227_s29 + $0x188] sm:$0xff] %vm809_vm0, %v737_v53  ;;  %v1958_v53 = vld [vmem:[%s2981_s1 + $0x34] ss:$0 sm:$0xff]  ;;  %v1576_v46 = vld [vmem:[%s2227_s29 + $0x168] sm:$0xff] (%p2040_p5) }
 0x153   : > { %858 = vst.msk [vmem:[%s2227_s29 + $0x180] sm:$0xff] %vm809_vm0, %v732_v54  ;;  %v1959_v54 = vld [vmem:[%s2981_s1 + $0x35] ss:$0 sm:$0xff] }
 0x154   : > { %1861 = vst.msk [vmem:[%s2227_s29 + $0x398] sm:$0xff] %vm809_vm0, %v1957_v52  ;;  %v1578_v47 = vld [vmem:[%s2227_s29 + $0x170] sm:$0xff] (%p2040_p5) }
 0x155   : > { %1862 = vst.msk [vmem:[%s2227_s29 + $0x3a0] sm:$0xff] %vm809_vm0, %v1958_v53 }
 0x156   : > { %1863 = vst.msk [vmem:[%s2227_s29 + $0x3a8] sm:$0xff] %vm809_vm0, %v1959_v54  ;;  %v1592_v54 = vld [vmem:[%s2227_s29 + $0x1a8] sm:$0xff] (%p2040_p5) }
 0x157   : > { %1525 = vst [vmem:[%s2714_s17 + $0x130] sm:$0xff] (%p2040_p5), %v1524_v20  ;;  %v1652_v20 = vld [vmem:[%s2227_s29 + $0x298] sm:$0xff] (%p2040_p5) }
 0x158   : > { %v802_v55 = vpop.permute.xlu2 %801  ;;  %1527 = vst [vmem:[%s2714_s17 + $0x140] sm:$0xff] (%p2040_p5), %v1526_v21  ;;  %v1654_v21 = vld [vmem:[%s2227_s29 + $0x2a0] sm:$0xff] (%p2040_p5) }
 0x159   : > { %v752_v56 = vpop.permute.xlu1 %751  ;;  %872 = vst.msk [vmem:[%s2227_s29 + $0x1f0] sm:$0xff] %vm809_vm0, %v802_v55  ;;  %v747_v57 = vpop.permute.xlu0 %746  ;;  %v1960_v55 = vld [vmem:[%s2981_s1 + $0x36] ss:$0 sm:$0xff]  ;;  %v1584_v50 = vld [vmem:[%s2227_s29 + $0x188] sm:$0xff] (%p2040_p5) }
 0x15a   : > { %862 = vst.msk [vmem:[%s2227_s29 + $0x1a0] sm:$0xff] %vm809_vm0, %v752_v56  ;;  %v1961_v56 = vld [vmem:[%s2981_s1 + $0x37] ss:$0 sm:$0xff]  ;;  %v1582_v49 = vld [vmem:[%s2227_s29 + $0x180] sm:$0xff] (%p2040_p5) }
 0x15b   : > { %861 = vst.msk [vmem:[%s2227_s29 + $0x198] sm:$0xff] %vm809_vm0, %v747_v57  ;;  %v1962_v57 = vld [vmem:[%s2981_s1 + $0x38] ss:$0 sm:$0xff] }
 0x15c   : > { %1864 = vst.msk [vmem:[%s2227_s29 + $0x3b0] sm:$0xff] %vm809_vm0, %v1960_v55 }
 0x15d   : > { %1865 = vst.msk [vmem:[%s2227_s29 + $0x3b8] sm:$0xff] %vm809_vm0, %v1961_v56 }
 0x15e   : > { %1866 = vst.msk [vmem:[%s2227_s29 + $0x3c0] sm:$0xff] %vm809_vm0, %v1962_v57  ;;  %v1598_v57 = vld [vmem:[%s2227_s29 + $0x1c0] sm:$0xff] (%p2040_p5) }
 0x15f   : > { %1529 = vst [vmem:[%s2714_s17 + $0x150] sm:$0xff] (%p2040_p5), %v1528_v22  ;;  %v1656_v22 = vld [vmem:[%s2227_s29 + $0x2a8] sm:$0xff] (%p2040_p5) }
 0x160   : > { %1531 = vst [vmem:[%s2714_s17 + $0x160] sm:$0xff] (%p2040_p5), %v1530_v23  ;;  %v1610_v63 = vld [vmem:[%s2227_s29 + $0x1f0] sm:$0xff] (%p2040_p5) }
 0x161   : > { %v767_v58 = vpop.permute.xlu1 %766  ;;  %v762_v59 = vpop.permute.xlu0 %761  ;;  %1533 = vst [vmem:[%s2714_s17 + $0x170] sm:$0xff] (%p2040_p5), %v1532_v24  ;;  %v1590_v53 = vld [vmem:[%s2227_s29 + $0x1a0] sm:$0xff] (%p2040_p5)  ;;  %v1658_v23 = vld [vmem:[%s2227_s29 + $0x2b0] sm:$0xff] (%p2040_p5)  ;;  %v1660_v24 = vld [vmem:[%s2227_s29 + $0x2b8] sm:$0xff] (%p2040_p5) }
 0x162   : > { %865 = vst.msk [vmem:[%s2227_s29 + $0x1b8] sm:$0xff] %vm809_vm0, %v767_v58  ;;  %v1963_v58 = vld [vmem:[%s2981_s1 + $0x39] ss:$0 sm:$0xff] }
 0x163   : > { %864 = vst.msk [vmem:[%s2227_s29 + $0x1b0] sm:$0xff] %vm809_vm0, %v762_v59  ;;  %v1964_v59 = vld [vmem:[%s2981_s1 + $0x3a] ss:$0 sm:$0xff] }
 0x164   : > { %1867 = vst.msk [vmem:[%s2227_s29 + $0x3c8] sm:$0xff] %vm809_vm0, %v1963_v58  ;;  %v1588_v52 = vld [vmem:[%s2227_s29 + $0x198] sm:$0xff] (%p2040_p5) }
 0x165   : > { %1868 = vst.msk [vmem:[%s2227_s29 + $0x3d0] sm:$0xff] %vm809_vm0, %v1964_v59 }
 0x166   : > { %1535 = vst [vmem:[%s2714_s17 + $0x180] sm:$0xff] (%p2040_p5), %v1534_v25  ;;  %v1662_v25 = vld [vmem:[%s2227_s29 + $0x2c0] sm:$0xff] (%p2040_p5) }
 0x167   : > { %1537 = vst [vmem:[%s2714_s17 + $0x190] sm:$0xff] (%p2040_p5), %v1536_v26  ;;  %v1664_v26 = vld [vmem:[%s2227_s29 + $0x2c8] sm:$0xff] (%p2040_p5) }
 0x168   : > { %1539 = vst [vmem:[%s2714_s17 + $0x1a0] sm:$0xff] (%p2040_p5), %v1538_v27  ;;  %v1666_v27 = vld [vmem:[%s2227_s29 + $0x2d0] sm:$0xff] (%p2040_p5) }
 0x169   : > { %v782_v60 = vpop.permute.xlu1 %781  ;;  %v777_v61 = vpop.permute.xlu0 %776  ;;  %1541 = vst [vmem:[%s2714_s17 + $0x1b0] sm:$0xff] (%p2040_p5), %v1540_v28  ;;  %v1596_v56 = vld [vmem:[%s2227_s29 + $0x1b8] sm:$0xff] (%p2040_p5) }
 0x16a   : > { %868 = vst.msk [vmem:[%s2227_s29 + $0x1d0] sm:$0xff] %vm809_vm0, %v782_v60  ;;  %v1965_v60 = vld [vmem:[%s2981_s1 + $0x3b] ss:$0 sm:$0xff]  ;;  %v1594_v55 = vld [vmem:[%s2227_s29 + $0x1b0] sm:$0xff] (%p2040_p5) }
 0x16b   : > { %867 = vst.msk [vmem:[%s2227_s29 + $0x1c8] sm:$0xff] %vm809_vm0, %v777_v61  ;;  %v1966_v61 = vld [vmem:[%s2981_s1 + $0x3c] ss:$0 sm:$0xff] }
 0x16c   : > { %1869 = vst.msk [vmem:[%s2227_s29 + $0x3d8] sm:$0xff] %vm809_vm0, %v1965_v60  ;;  %v1604_v60 = vld [vmem:[%s2227_s29 + $0x1d8] sm:$0xff] (%p2040_p5) }
 0x16d   : > { %1870 = vst.msk [vmem:[%s2227_s29 + $0x3e0] sm:$0xff] %vm809_vm0, %v1966_v61  ;;  %v1668_v28 = vld [vmem:[%s2227_s29 + $0x2d8] sm:$0xff] (%p2040_p5) }
 0x16e   : > { %1543 = vst [vmem:[%s2714_s17 + $0x1c0] sm:$0xff] (%p2040_p5), %v1542_v29  ;;  %v1670_v29 = vld [vmem:[%s2227_s29 + $0x2e0] sm:$0xff] (%p2040_p5) }
 0x16f   : > { %1545 = vst [vmem:[%s2714_s17 + $0x1d0] sm:$0xff] (%p2040_p5), %v1544_v30  ;;  %v1672_v30 = vld [vmem:[%s2227_s29 + $0x2e8] sm:$0xff] (%p2040_p5) }
 0x170   : > { %1547 = vst [vmem:[%s2714_s17 + $0x1e0] sm:$0xff] (%p2040_p5), %v1546_v31  ;;  %v1674_v31 = vld [vmem:[%s2227_s29 + $0x2f0] sm:$0xff] (%p2040_p5) }
 0x171   : > { %v797_v0 = vpop.permute.xlu1 %796  ;;  %v792_v2 = vpop.permute.xlu0 %791  ;;  %1549 = vst [vmem:[%s2714_s17 + $0x1f0] sm:$0xff] (%p2040_p5), %v1548_v32  ;;  %v1602_v59 = vld [vmem:[%s2227_s29 + $0x1d0] sm:$0xff] (%p2040_p5)  ;;  %v1676_v32 = vld [vmem:[%s2227_s29 + $0x2f8] sm:$0xff] (%p2040_p5) }
 0x172   : > { %871 = vst.msk [vmem:[%s2227_s29 + $0x1e8] sm:$0xff] %vm809_vm0, %v797_v0  ;;  %v1969_v0 = vld [vmem:[%s2981_s1 + $0x3f] ss:$0 sm:$0xff]  ;;  %v1600_v58 = vld [vmem:[%s2227_s29 + $0x1c8] sm:$0xff] (%p2040_p5) }
 0x173   : > { %870 = vst.msk [vmem:[%s2227_s29 + $0x1e0] sm:$0xff] %vm809_vm0, %v792_v2  ;;  %v1488_v2 = vld [vmem:[%s2227_s29 + $0x8] sm:$0xff] (%p2040_p5) }
 0x174   : > { %1873 = vst.msk [vmem:[%s2227_s29 + $0x3f8] sm:$0xff] %vm809_vm0, %v1969_v0 }
 0x175   : > { %1489 = vst [vmem:[%s2714_s17 + $0x10] sm:$0xff] (%p2040_p5), %v1488_v2  ;;  %v1616_v2 = vld [vmem:[%s2227_s29 + $0x208] sm:$0xff] (%p2040_p5) }
 0x176   : > { %1201 = sbr.rel (!%p2040_p5) target bundleno = 472 (0x1d8), region = 70  ;;  %1551 = vst [vmem:[%s2714_s17 + $0x200] sm:$0xff] (%p2040_p5), %v1550_v33  ;;  %v1678_v33 = vld [vmem:[%s2227_s29 + $0x300] sm:$0xff] (%p2040_p5) }
 0x177   : > { %1553 = vst [vmem:[%s2714_s17 + $0x210] sm:$0xff] (%p2040_p5), %v1552_v34  ;;  %v1680_v34 = vld [vmem:[%s2227_s29 + $0x308] sm:$0xff] (%p2040_p5) }
 0x178   : > { %1555 = vst [vmem:[%s2714_s17 + $0x220] sm:$0xff] (%p2040_p5), %v1554_v35  ;;  %v1682_v35 = vld [vmem:[%s2227_s29 + $0x310] sm:$0xff] (%p2040_p5) }
 0x179   : > { %v807_v10 = vpop.permute.xlu0 %806  ;;  %1557 = vst [vmem:[%s2714_s17 + $0x230] sm:$0xff] (%p2040_p5), %v1556_v36  ;;  %v1608_v62 = vld [vmem:[%s2227_s29 + $0x1e8] sm:$0xff] (%p2040_p5)  ;;  %v1684_v36 = vld [vmem:[%s2227_s29 + $0x318] sm:$0xff] (%p2040_p5) }
 0x17a   : > { %873 = vst.msk [vmem:[%s2227_s29 + $0x1f8] sm:$0xff] %vm809_vm0, %v807_v10  ;;  %v1504_v10 = vld [vmem:[%s2227_s29 + $0x48] sm:$0xff] (%p2040_p5)  ;;  %v1606_v61 = vld [vmem:[%s2227_s29 + $0x1e0] sm:$0xff] (%p2040_p5) }
 0x17b   : > { %1505 = vst [vmem:[%s2714_s17 + $0x90] sm:$0xff] %v1504_v10  ;;  %v1632_v10 = vld [vmem:[%s2227_s29 + $0x248] sm:$0xff] }
 0x17c   : > { %1559 = vst [vmem:[%s2714_s17 + $0x240] sm:$0xff] %v1558_v37  ;;  %v1686_v37 = vld [vmem:[%s2227_s29 + $0x320] sm:$0xff] }
 0x17d   : > { %1561 = vst [vmem:[%s2714_s17 + $0x250] sm:$0xff] %v1560_v38  ;;  %v1688_v38 = vld [vmem:[%s2227_s29 + $0x328] sm:$0xff] }
 0x17e   : > { %1563 = vst [vmem:[%s2714_s17 + $0x260] sm:$0xff] %v1562_v39  ;;  %v1690_v39 = vld [vmem:[%s2227_s29 + $0x330] sm:$0xff] }
 0x17f   : > { %1565 = vst [vmem:[%s2714_s17 + $0x270] sm:$0xff] %v1564_v40  ;;  %v1692_v40 = vld [vmem:[%s2227_s29 + $0x338] sm:$0xff] }
 0x180   : > { %1567 = vst [vmem:[%s2714_s17 + $0x280] sm:$0xff] %v1566_v41  ;;  %v1694_v41 = vld [vmem:[%s2227_s29 + $0x340] sm:$0xff] }
 0x181   : > { %1569 = vst [vmem:[%s2714_s17 + $0x290] sm:$0xff] %v1568_v42  ;;  %v1612_v0 = vld [vmem:[%s2227_s29 + $0x1f8] sm:$0xff]  ;;  %v1696_v42 = vld [vmem:[%s2227_s29 + $0x348] sm:$0xff] }
 0x182   : > { %1571 = vst [vmem:[%s2714_s17 + $0x2a0] sm:$0xff] %v1570_v43  ;;  %v1698_v43 = vld [vmem:[%s2227_s29 + $0x350] sm:$0xff] }
 0x183   : > { %1573 = vst [vmem:[%s2714_s17 + $0x2b0] sm:$0xff] %v1572_v44  ;;  %v1700_v44 = vld [vmem:[%s2227_s29 + $0x358] sm:$0xff] }
 0x184   : > { %1575 = vst [vmem:[%s2714_s17 + $0x2c0] sm:$0xff] %v1574_v45  ;;  %v1702_v45 = vld [vmem:[%s2227_s29 + $0x360] sm:$0xff] }
 0x185   : > { %1577 = vst [vmem:[%s2714_s17 + $0x2d0] sm:$0xff] %v1576_v46  ;;  %v1704_v46 = vld [vmem:[%s2227_s29 + $0x368] sm:$0xff] }
 0x186   : > { %1579 = vst [vmem:[%s2714_s17 + $0x2e0] sm:$0xff] %v1578_v47  ;;  %v1706_v47 = vld [vmem:[%s2227_s29 + $0x370] sm:$0xff] }
 0x187   : > { %1581 = vst [vmem:[%s2714_s17 + $0x2f0] sm:$0xff] %v1580_v48  ;;  %v1708_v48 = vld [vmem:[%s2227_s29 + $0x378] sm:$0xff] }
 0x188   : > { %1583 = vst [vmem:[%s2714_s17 + $0x300] sm:$0xff] %v1582_v49  ;;  %v1710_v49 = vld [vmem:[%s2227_s29 + $0x380] sm:$0xff] }
 0x189   : > { %1585 = vst [vmem:[%s2714_s17 + $0x310] sm:$0xff] %v1584_v50  ;;  %v1712_v50 = vld [vmem:[%s2227_s29 + $0x388] sm:$0xff] }
 0x18a   : > { %1587 = vst [vmem:[%s2714_s17 + $0x320] sm:$0xff] %v1586_v51  ;;  %v1714_v51 = vld [vmem:[%s2227_s29 + $0x390] sm:$0xff] }
 0x18b   : > { %1589 = vst [vmem:[%s2714_s17 + $0x330] sm:$0xff] %v1588_v52  ;;  %v1716_v52 = vld [vmem:[%s2227_s29 + $0x398] sm:$0xff] }
 0x18c   : > { %1591 = vst [vmem:[%s2714_s17 + $0x340] sm:$0xff] %v1590_v53  ;;  %v1718_v53 = vld [vmem:[%s2227_s29 + $0x3a0] sm:$0xff] }
 0x18d   : > { %1593 = vst [vmem:[%s2714_s17 + $0x350] sm:$0xff] %v1592_v54  ;;  %v1720_v54 = vld [vmem:[%s2227_s29 + $0x3a8] sm:$0xff] }
 0x18e   : > { %1595 = vst [vmem:[%s2714_s17 + $0x360] sm:$0xff] %v1594_v55  ;;  %v1722_v55 = vld [vmem:[%s2227_s29 + $0x3b0] sm:$0xff] }
 0x18f   : > { %1597 = vst [vmem:[%s2714_s17 + $0x370] sm:$0xff] %v1596_v56  ;;  %v1724_v56 = vld [vmem:[%s2227_s29 + $0x3b8] sm:$0xff] }
 0x190   : > { %1599 = vst [vmem:[%s2714_s17 + $0x380] sm:$0xff] %v1598_v57  ;;  %v1726_v57 = vld [vmem:[%s2227_s29 + $0x3c0] sm:$0xff] }
 0x191   : > { %1601 = vst [vmem:[%s2714_s17 + $0x390] sm:$0xff] %v1600_v58  ;;  %v1728_v58 = vld [vmem:[%s2227_s29 + $0x3c8] sm:$0xff] }
 0x192   : > { %1603 = vst [vmem:[%s2714_s17 + $0x3a0] sm:$0xff] %v1602_v59  ;;  %v1730_v59 = vld [vmem:[%s2227_s29 + $0x3d0] sm:$0xff] }
 0x193   : > { %1605 = vst [vmem:[%s2714_s17 + $0x3b0] sm:$0xff] %v1604_v60  ;;  %v1732_v60 = vld [vmem:[%s2227_s29 + $0x3d8] sm:$0xff] }
 0x194   : > { %1607 = vst [vmem:[%s2714_s17 + $0x3c0] sm:$0xff] %v1606_v61  ;;  %v1734_v61 = vld [vmem:[%s2227_s29 + $0x3e0] sm:$0xff] }
 0x195   : > { %1609 = vst [vmem:[%s2714_s17 + $0x3d0] sm:$0xff] %v1608_v62  ;;  %v1736_v62 = vld [vmem:[%s2227_s29 + $0x3e8] sm:$0xff] }
 0x196   : > { %1611 = vst [vmem:[%s2714_s17 + $0x3e0] sm:$0xff] %v1610_v63  ;;  %v1738_v63 = vld [vmem:[%s2227_s29 + $0x3f0] sm:$0xff] }
 0x197   : > { %1613 = vst [vmem:[%s2714_s17 + $0x3f0] sm:$0xff] %v1612_v0  ;;  %v1740_v0 = vld [vmem:[%s2227_s29 + $0x3f8] sm:$0xff] }
 0x198   : > { %1615 = vst [vmem:[%s2714_s17 + $0x400] sm:$0xff] %v1614_v1 }
 0x199   : > { %1617 = vst [vmem:[%s2714_s17 + $0x410] sm:$0xff] %v1616_v2 }
 0x19a   : > { %1619 = vst [vmem:[%s2714_s17 + $0x420] sm:$0xff] %v1618_v3 }
 0x19b   : > { %1621 = vst [vmem:[%s2714_s17 + $0x430] sm:$0xff] %v1620_v4 }
 0x19c   : > { %1623 = vst [vmem:[%s2714_s17 + $0x440] sm:$0xff] %v1622_v5 }
 0x19d   : > { %1625 = vst [vmem:[%s2714_s17 + $0x450] sm:$0xff] %v1624_v6 }
 0x19e   : > { %1627 = vst [vmem:[%s2714_s17 + $0x460] sm:$0xff] %v1626_v7 }
 0x19f   : > { %1629 = vst [vmem:[%s2714_s17 + $0x470] sm:$0xff] %v1628_v8 }
 0x1a0   : > { %1631 = vst [vmem:[%s2714_s17 + $0x480] sm:$0xff] %v1630_v9 }
 0x1a1   : > { %1633 = vst [vmem:[%s2714_s17 + $0x490] sm:$0xff] %v1632_v10 }
 0x1a2   : > { %1635 = vst [vmem:[%s2714_s17 + $0x4a0] sm:$0xff] %v1634_v11 }
 0x1a3   : > { %1637 = vst [vmem:[%s2714_s17 + $0x4b0] sm:$0xff] %v1636_v12 }
 0x1a4   : > { %1639 = vst [vmem:[%s2714_s17 + $0x4c0] sm:$0xff] %v1638_v13 }
 0x1a5   : > { %1641 = vst [vmem:[%s2714_s17 + $0x4d0] sm:$0xff] %v1640_v14 }
 0x1a6   : > { %1643 = vst [vmem:[%s2714_s17 + $0x4e0] sm:$0xff] %v1642_v15 }
 0x1a7   : > { %1645 = vst [vmem:[%s2714_s17 + $0x4f0] sm:$0xff] %v1644_v16 }
 0x1a8   : > { %1647 = vst [vmem:[%s2714_s17 + $0x500] sm:$0xff] %v1646_v17 }
 0x1a9   : > { %1649 = vst [vmem:[%s2714_s17 + $0x510] sm:$0xff] %v1648_v18 }
 0x1aa   : > { %1651 = vst [vmem:[%s2714_s17 + $0x520] sm:$0xff] %v1650_v19 }
 0x1ab   : > { %1653 = vst [vmem:[%s2714_s17 + $0x530] sm:$0xff] %v1652_v20 }
 0x1ac   : > { %1655 = vst [vmem:[%s2714_s17 + $0x540] sm:$0xff] %v1654_v21 }
 0x1ad   : > { %1657 = vst [vmem:[%s2714_s17 + $0x550] sm:$0xff] %v1656_v22 }
 0x1ae   : > { %1659 = vst [vmem:[%s2714_s17 + $0x560] sm:$0xff] %v1658_v23 }
 0x1af   : > { %1661 = vst [vmem:[%s2714_s17 + $0x570] sm:$0xff] %v1660_v24 }
 0x1b0   : > { %1663 = vst [vmem:[%s2714_s17 + $0x580] sm:$0xff] %v1662_v25 }
 0x1b1   : > { %1665 = vst [vmem:[%s2714_s17 + $0x590] sm:$0xff] %v1664_v26 }
 0x1b2   : > { %1667 = vst [vmem:[%s2714_s17 + $0x5a0] sm:$0xff] %v1666_v27 }
 0x1b3   : > { %1669 = vst [vmem:[%s2714_s17 + $0x5b0] sm:$0xff] %v1668_v28 }
 0x1b4   : > { %1671 = vst [vmem:[%s2714_s17 + $0x5c0] sm:$0xff] %v1670_v29 }
 0x1b5   : > { %1673 = vst [vmem:[%s2714_s17 + $0x5d0] sm:$0xff] %v1672_v30 }
 0x1b6   : > { %1675 = vst [vmem:[%s2714_s17 + $0x5e0] sm:$0xff] %v1674_v31 }
 0x1b7   : > { %1677 = vst [vmem:[%s2714_s17 + $0x5f0] sm:$0xff] %v1676_v32 }
 0x1b8   : > { %1679 = vst [vmem:[%s2714_s17 + $0x600] sm:$0xff] %v1678_v33 }
 0x1b9   : > { %1681 = vst [vmem:[%s2714_s17 + $0x610] sm:$0xff] %v1680_v34 }
 0x1ba   : > { %1683 = vst [vmem:[%s2714_s17 + $0x620] sm:$0xff] %v1682_v35 }
 0x1bb   : > { %1685 = vst [vmem:[%s2714_s17 + $0x630] sm:$0xff] %v1684_v36 }
 0x1bc   : > { %1687 = vst [vmem:[%s2714_s17 + $0x640] sm:$0xff] %v1686_v37 }
 0x1bd   : > { %1689 = vst [vmem:[%s2714_s17 + $0x650] sm:$0xff] %v1688_v38 }
 0x1be   : > { %1691 = vst [vmem:[%s2714_s17 + $0x660] sm:$0xff] %v1690_v39 }
 0x1bf   : > { %1693 = vst [vmem:[%s2714_s17 + $0x670] sm:$0xff] %v1692_v40 }
 0x1c0   : > { %1695 = vst [vmem:[%s2714_s17 + $0x680] sm:$0xff] %v1694_v41 }
 0x1c1   : > { %1697 = vst [vmem:[%s2714_s17 + $0x690] sm:$0xff] %v1696_v42 }
 0x1c2   : > { %1699 = vst [vmem:[%s2714_s17 + $0x6a0] sm:$0xff] %v1698_v43 }
 0x1c3   : > { %1701 = vst [vmem:[%s2714_s17 + $0x6b0] sm:$0xff] %v1700_v44 }
 0x1c4   : > { %1703 = vst [vmem:[%s2714_s17 + $0x6c0] sm:$0xff] %v1702_v45 }
 0x1c5   : > { %1705 = vst [vmem:[%s2714_s17 + $0x6d0] sm:$0xff] %v1704_v46 }
 0x1c6   : > { %1707 = vst [vmem:[%s2714_s17 + $0x6e0] sm:$0xff] %v1706_v47 }
 0x1c7   : > { %1709 = vst [vmem:[%s2714_s17 + $0x6f0] sm:$0xff] %v1708_v48 }
 0x1c8   : > { %1711 = vst [vmem:[%s2714_s17 + $0x700] sm:$0xff] %v1710_v49 }
 0x1c9   : > { %1713 = vst [vmem:[%s2714_s17 + $0x710] sm:$0xff] %v1712_v50 }
 0x1ca   : > { %1715 = vst [vmem:[%s2714_s17 + $0x720] sm:$0xff] %v1714_v51 }
 0x1cb   : > { %1717 = vst [vmem:[%s2714_s17 + $0x730] sm:$0xff] %v1716_v52 }
 0x1cc   : > { %1719 = vst [vmem:[%s2714_s17 + $0x740] sm:$0xff] %v1718_v53 }
 0x1cd   : > { %1721 = vst [vmem:[%s2714_s17 + $0x750] sm:$0xff] %v1720_v54 }
 0x1ce   : > { %1723 = vst [vmem:[%s2714_s17 + $0x760] sm:$0xff] %v1722_v55 }
 0x1cf   : > { %1725 = vst [vmem:[%s2714_s17 + $0x770] sm:$0xff] %v1724_v56 }
 0x1d0   : > { %1727 = vst [vmem:[%s2714_s17 + $0x780] sm:$0xff] %v1726_v57 }
 0x1d1   : > { %1729 = vst [vmem:[%s2714_s17 + $0x790] sm:$0xff] %v1728_v58 }
 0x1d2   : > { %1731 = vst [vmem:[%s2714_s17 + $0x7a0] sm:$0xff] %v1730_v59 }
 0x1d3   : > { %1733 = vst [vmem:[%s2714_s17 + $0x7b0] sm:$0xff] %v1732_v60 }
 0x1d4   : > { %1735 = vst [vmem:[%s2714_s17 + $0x7c0] sm:$0xff] %v1734_v61 }
 0x1d5   : > { %1737 = vst [vmem:[%s2714_s17 + $0x7d0] sm:$0xff] %v1736_v62 }
 0x1d6   : > { %1739 = vst [vmem:[%s2714_s17 + $0x7e0] sm:$0xff] %v1738_v63 }
 0x1d7   : > { %1741 = vst [vmem:[%s2714_s17 + $0x7f0] sm:$0xff] %v1740_v0 }
 0x1d8 PF: > { %p9_p10 = scmp.ge.s32.totalorder %s2027_s13, 4   ;;  %s2984_s9 = smov %s1988_s10 }
 0x1d9   : > { %s2985_s10 = smov %s2038_s16  ;;  %s2986_s11 = smov %s2027_s13 }
 0x1da   :  { %11 = sbr.rel (!%p9_p10) target bundleno = 2 (0x2), region = 140 }

</bundles_post_ra>
